<compile_context>
chip_gen: v7x
topology: tpu7x:2x2x1
jax: 0.10.0
libtpu: 0.0.40
codegen_flags: <defaults>
</compile_context>

<pallas_src>
import functools

import jax
import jax.numpy as jnp
from jax.experimental import pallas as pl
from jax.experimental.pallas import tpu as pltpu


GATE_LANES = 128                 # each gate padded to its own vreg-wide block
N_GATES = 4
SLAB_LANES = GATE_LANES * N_GATES  # 512


def _round_up(n, m):
    return (n + m - 1) // m * m


def _layout(input_size, H1, H2, out):
    """Row layout of the single merged weight slab (all offsets 8-aligned)."""
    in_pad = _round_up(input_size, 8)
    k1 = _round_up(H1, 8)            # contraction rows for Whh1 / Wih2
    k2 = _round_up(H2, 8)            # contraction rows for Whh2 / W_eff
    lay = {"in_pad": in_pad, "k1": k1, "k2": k2}
    off = 0
    lay["wih1"] = off; off += in_pad
    lay["whh1"] = off; off += k1
    lay["b1"] = off;   off = _round_up(off + 1, 8)
    lay["wih2"] = off; off += k1
    lay["whh2"] = off; off += k2
    lay["b2"] = off;   off = _round_up(off + 1, 8)
    lay["whead"] = off; off += k2
    lay["bhead"] = off; off = _round_up(off + 1, 8)
    lay["rows"] = off
    return lay


# ---------------------------------------------------------------------------
# Kernel: whole 2-layer LSTM + folded linear head, single grid point.
# ---------------------------------------------------------------------------
def _lstm_kernel(x_ref, w_ref, out_ref, *, lay, T):
    G = GATE_LANES
    in_pad, k1, k2 = lay["in_pad"], lay["k1"], lay["k2"]

    # Static, sublane-aligned weight views (all padding rows/lanes are zero).
    wih1 = w_ref[lay["wih1"]:lay["wih1"] + in_pad, :]      # (in_pad, 512)
    whh1 = w_ref[lay["whh1"]:lay["whh1"] + k1, :]          # (k1,     512)
    b1 = w_ref[lay["b1"]:lay["b1"] + 1, :]                 # (1,      512)
    wih2 = w_ref[lay["wih2"]:lay["wih2"] + k1, :]          # (k1,     512)
    whh2 = w_ref[lay["whh2"]:lay["whh2"] + k2, :]          # (k2,     512)
    b2 = w_ref[lay["b2"]:lay["b2"] + 1, :]                 # (1,      512)
    whead = w_ref[lay["whead"]:lay["whead"] + k2, 0:G]     # (k2,     128)  folded linear1@linear2
    bhead = w_ref[lay["bhead"]:lay["bhead"] + 1, 0:G]      # (1,      128)

    # Layer-1 input projection for ALL timesteps, hoisted out of the recurrence.
    x_proj = jnp.dot(x_ref[...], wih1,
                     preferred_element_type=jnp.float32) + b1   # (T, 512)

    def sig(v):
        # sigmoid(x) == 0.5*tanh(0.5*x) + 0.5 : one EUP push, no divide.
        return 0.5 * jnp.tanh(0.5 * v) + 0.5

    def cell(pre, c_prev):
        # pre: (1, 512) fused gate pre-activations, PyTorch order [i, f, g, o],
        # each gate in its own 128-lane block -> vreg-boundary slices are free.
        i = sig(pre[:, 0:G])
        f = sig(pre[:, G:2 * G])
        g = jnp.tanh(pre[:, 2 * G:3 * G])
        o = sig(pre[:, 3 * G:4 * G])
        c_new = f * c_prev + i * g
        h_new = o * jnp.tanh(c_new)
        # Padded lanes: pre==0 -> i=f=o=0.5, g=0 -> c,h stay exactly 0 forever.
        return h_new, c_new

    h1 = jnp.zeros((1, G), jnp.float32)
    c1 = jnp.zeros((1, G), jnp.float32)
    h2 = jnp.zeros((1, G), jnp.float32)
    c2 = jnp.zeros((1, G), jnp.float32)

    # Fully unrolled recurrence (T is tiny and static): static slices, full LLO
    # scheduling visibility across timesteps.
    for t in range(T):
        pre1 = x_proj[t:t + 1, :] + jnp.dot(
            h1[:, 0:k1], whh1, preferred_element_type=jnp.float32)   # (1, 512)
        h1, c1 = cell(pre1, c1)

        # Layer 2: no concat — two small matmuls that overlap in the MXU.
        pre2 = (jnp.dot(h1[:, 0:k1], wih2, preferred_element_type=jnp.float32)
                + jnp.dot(h2[:, 0:k2], whh2, preferred_element_type=jnp.float32)
                + b2)                                                 # (1, 512)
        h2, c2 = cell(pre2, c2)

    # Folded linear head on the LAST timestep only (predictions2[-1]).
    out_ref[...] = (jnp.dot(h2[:, 0:k2], whead,
                            preferred_element_type=jnp.float32) + bhead)


def lstm_forward(x, slab, *, input_size, hidden, output_size):
    """x: (T, input_size) f32. Returns (output_size,) — predictions2[-1]."""
    T = x.shape[0]
    H1, H2 = hidden, 2 * hidden
    lay = _layout(input_size, H1, H2, output_size)

    # Pad features to a sublane-aligned contraction dim (extra lanes are zero).
    x_pad = jnp.zeros((T, lay["in_pad"]), jnp.float32).at[:, :input_size].set(x)

    kernel = functools.partial(_lstm_kernel, lay=lay, T=T)
    vmem = pl.BlockSpec(memory_space=pltpu.MemorySpace.VMEM)
    out = pl.pallas_call(
        kernel,
        out_shape=jax.ShapeDtypeStruct((1, GATE_LANES), jnp.float32),
        in_specs=[vmem, vmem],
        out_specs=vmem,
    )(x_pad, slab)
    return out[0, :output_size]


# ---------------------------------------------------------------------------
# Deterministic parameter construction (mirrors nn.LSTM / nn.Linear shapes).
# ---------------------------------------------------------------------------
def _uniform(key, shape, bound):
    return jax.random.uniform(key, shape, jnp.float32, -bound, bound)


def build_raw_params(key, input_size=3, hidden=15, output=3):
    """Raw PyTorch-shaped parameters (used by the reference and for packing)."""
    H1, H2 = hidden, hidden * 2
    ks = jax.random.split(key, 12)
    k1 = H1 ** -0.5
    k2 = H2 ** -0.5

    # nn.LSTM(input_size, H1): weight_ih (4H1, in), weight_hh (4H1, H1), biases (4H1,)
    w_ih1 = _uniform(ks[0], (4 * H1, input_size), k1)
    w_hh1 = _uniform(ks[1], (4 * H1, H1), k1)
    b_ih1 = _uniform(ks[2], (4 * H1,), k1)
    b_hh1 = _uniform(ks[3], (4 * H1,), k1)

    # nn.LSTM(H1, H2)
    w_ih2 = _uniform(ks[4], (4 * H2, H1), k2)
    w_hh2 = _uniform(ks[5], (4 * H2, H2), k2)
    b_ih2 = _uniform(ks[6], (4 * H2,), k2)
    b_hh2 = _uniform(ks[7], (4 * H2,), k2)

    # nn.Linear(H2, 2*output), nn.Linear(2*output, output)
    kl1 = H2 ** -0.5
    kl2 = (2 * output) ** -0.5
    w_l1 = _uniform(ks[8], (2 * output, H2), kl1)
    b_l1 = _uniform(ks[9], (2 * output,), kl1)
    w_l2 = _uniform(ks[10], (output, 2 * output), kl2)
    b_l2 = _uniform(ks[11], (output,), kl2)

    return (w_ih1, w_hh1, b_ih1, b_hh1, w_ih2, w_hh2, b_ih2, b_hh2,
            w_l1, b_l1, w_l2, b_l2)


def _gate_pad(w_t, H):
    """(K, 4H) with gates [i,f,g,o] of width H -> (K, 512) with each gate in
    its own 128-lane block (remaining lanes zero)."""
    K = w_t.shape[0]
    out = jnp.zeros((K, SLAB_LANES), jnp.float32)
    for g in range(N_GATES):
        out = out.at[:, g * GATE_LANES:g * GATE_LANES + H].set(
            w_t[:, g * H:(g + 1) * H])
    return out


def pack_params(raw, input_size, hidden, output):
    """Pack ALL raw params into one lane-dense, sublane-aligned VMEM slab."""
    (w_ih1, w_hh1, b_ih1, b_hh1, w_ih2, w_hh2, b_ih2, b_hh2,
     w_l1, b_l1, w_l2, b_l2) = raw
    H1, H2 = hidden, 2 * hidden
    lay = _layout(input_size, H1, H2, output)
    HIGH = jax.lax.Precision.HIGHEST

    slab = jnp.zeros((lay["rows"], SLAB_LANES), jnp.float32)

    # Layer 1.
    slab = slab.at[lay["wih1"]:lay["wih1"] + input_size, :].set(_gate_pad(w_ih1.T, H1))
    slab = slab.at[lay["whh1"]:lay["whh1"] + H1, :].set(_gate_pad(w_hh1.T, H1))
    slab = slab.at[lay["b1"], :].set(_gate_pad((b_ih1 + b_hh1)[None, :], H1)[0])

    # Layer 2.
    slab = slab.at[lay["wih2"]:lay["wih2"] + H1, :].set(_gate_pad(w_ih2.T, H2))
    slab = slab.at[lay["whh2"]:lay["whh2"] + H2, :].set(_gate_pad(w_hh2.T, H2))
    slab = slab.at[lay["b2"], :].set(_gate_pad((b_ih2 + b_hh2)[None, :], H2)[0])

    # Folded linear head: p2 = h2 @ (W_l1.T @ W_l2.T) + (b_l1 @ W_l2.T + b_l2).
    w_eff = jnp.dot(w_l1.T, w_l2.T, precision=HIGH)        # (H2, out)
    b_eff = jnp.dot(b_l1, w_l2.T, precision=HIGH) + b_l2    # (out,)
    slab = slab.at[lay["whead"]:lay["whead"] + H2, 0:output].set(w_eff)
    slab = slab.at[lay["bhead"], 0:output].set(b_eff)

    return slab


# ---------------------------------------------------------------------------
# Pure-JAX reference (PyTorch LSTM math from the RAW parameters, so packing
# mistakes are caught).  Matmuls at HIGHEST precision for a true f32 gold.
# ---------------------------------------------------------------------------
def ref_forward(x, raw):
    (w_ih1, w_hh1, b_ih1, b_hh1, w_ih2, w_hh2, b_ih2, b_hh2,
     w_l1, b_l1, w_l2, b_l2) = raw
    HIGH = jax.lax.Precision.HIGHEST

    def cell(xt, h, c, w_ih, w_hh, b_ih, b_hh):
        H = h.shape[-1]
        z = (jnp.dot(xt, w_ih.T, precision=HIGH)
             + jnp.dot(h, w_hh.T, precision=HIGH) + b_ih + b_hh)
        i = jax.nn.sigmoid(z[0:H])
        f = jax.nn.sigmoid(z[H:2 * H])
        g = jnp.tanh(z[2 * H:3 * H])
        o = jax.nn.sigmoid(z[3 * H:4 * H])
        c = f * c + i * g
        return o * jnp.tanh(c), c

    H1, H2 = w_hh1.shape[1], w_hh2.shape[1]
    h1 = jnp.zeros((H1,)); c1 = jnp.zeros((H1,))
    h2 = jnp.zeros((H2,)); c2 = jnp.zeros((H2,))
    for t in range(x.shape[0]):
        h1, c1 = cell(x[t], h1, c1, w_ih1, w_hh1, b_ih1, b_hh1)
        h2, c2 = cell(h1, h2, c2, w_ih2, w_hh2, b_ih2, b_hh2)
    p1 = jnp.dot(h2, w_l1.T, precision=HIGH) + b_l1
    p2 = jnp.dot(p1, w_l2.T, precision=HIGH) + b_l2
    return p2


if __name__ == "__main__":
    INPUT_SIZE, HIDDEN, OUTPUT, SEQ = 3, 15, 3, 8

    key = jax.random.PRNGKey(0)
    k_params, k_x = jax.random.split(key)
    raw = build_raw_params(k_params, INPUT_SIZE, HIDDEN, OUTPUT)
    slab = pack_params(raw, INPUT_SIZE, HIDDEN, OUTPUT)
    x = jax.random.normal(k_x, (SEQ, INPUT_SIZE), jnp.float32)

    run = jax.jit(functools.partial(lstm_forward, input_size=INPUT_SIZE,
                                    hidden=HIDDEN, output_size=OUTPUT))
    out = jax.block_until_ready(run(x, slab))

    ref = ref_forward(x, raw)
    assert out.shape == (OUTPUT,), out.shape
    assert jnp.allclose(out, ref, atol=5e-4, rtol=5e-4), (out, ref)
    print("KERNEL_OK")
</pallas_src>

<mosaic_0001>
module attributes {stable_mosaic.version = 11 : i64} {
  func.func @_lstm_kernel(%arg0: memref<8x8xf32, #tpu.memory_space<vmem>>, %arg1: memref<128x512xf32, #tpu.memory_space<vmem>>, %arg2: memref<1x128xf32, #tpu.memory_space<vmem>>) attributes {dimension_semantics = [], scalar_prefetch = 0 : i64, scratch_operands = 0 : i64, tpu.core_type = #tpu.core_type<tc>} {
    %c0 = arith.constant 0 : index
    %c0_0 = arith.constant 0 : index
    %0 = vector.load %arg1[%c0, %c0_0] : memref<128x512xf32, #tpu.memory_space<vmem>>, vector<8x512xf32>
    %c8 = arith.constant 8 : index
    %c0_1 = arith.constant 0 : index
    %1 = vector.load %arg1[%c8, %c0_1] : memref<128x512xf32, #tpu.memory_space<vmem>>, vector<16x512xf32>
    %c24 = arith.constant 24 : index
    %c0_2 = arith.constant 0 : index
    %2 = vector.load %arg1[%c24, %c0_2] : memref<128x512xf32, #tpu.memory_space<vmem>>, vector<1x512xf32>
    %c32 = arith.constant 32 : index
    %c0_3 = arith.constant 0 : index
    %3 = vector.load %arg1[%c32, %c0_3] : memref<128x512xf32, #tpu.memory_space<vmem>>, vector<16x512xf32>
    %c48 = arith.constant 48 : index
    %c0_4 = arith.constant 0 : index
    %4 = vector.load %arg1[%c48, %c0_4] : memref<128x512xf32, #tpu.memory_space<vmem>>, vector<32x512xf32>
    %c80 = arith.constant 80 : index
    %c0_5 = arith.constant 0 : index
    %5 = vector.load %arg1[%c80, %c0_5] : memref<128x512xf32, #tpu.memory_space<vmem>>, vector<1x512xf32>
    %c88 = arith.constant 88 : index
    %c0_6 = arith.constant 0 : index
    %6 = vector.load %arg1[%c88, %c0_6] : memref<128x512xf32, #tpu.memory_space<vmem>>, vector<32x128xf32>
    %c120 = arith.constant 120 : index
    %c0_7 = arith.constant 0 : index
    %7 = vector.load %arg1[%c120, %c0_7] : memref<128x512xf32, #tpu.memory_space<vmem>>, vector<1x128xf32>
    %c0_8 = arith.constant 0 : index
    %c0_9 = arith.constant 0 : index
    %8 = vector.load %arg0[%c0_8, %c0_9] : memref<8x8xf32, #tpu.memory_space<vmem>>, vector<8x8xf32>
    %cst = arith.constant dense<0.000000e+00> : vector<8x512xf32>
    %9 = tpu.matmul %8, %0, %cst {dimension_numbers = #tpu.dot_dimension_numbers<[1], [0], [0], [1], [0, 0, 1, 1], [], []>} : vector<8x8xf32>, vector<8x512xf32>, vector<8x512xf32> -> vector<8x512xf32>
    %10 = vector.broadcast %2 : vector<1x512xf32> to vector<8x512xf32>
    %11 = arith.addf %9, %10 : vector<8x512xf32>
    %cst_10 = arith.constant 0.000000e+00 : f32
    %12 = vector.broadcast %cst_10 : f32 to vector<1x128xf32>
    %cst_11 = arith.constant 0.000000e+00 : f32
    %13 = vector.broadcast %cst_11 : f32 to vector<1x128xf32>
    %cst_12 = arith.constant 0.000000e+00 : f32
    %14 = vector.broadcast %cst_12 : f32 to vector<1x128xf32>
    %cst_13 = arith.constant 0.000000e+00 : f32
    %15 = vector.broadcast %cst_13 : f32 to vector<1x128xf32>
    %16 = vector.extract_strided_slice %11 {offsets = [0, 0], sizes = [1, 512], strides = [1, 1]} : vector<8x512xf32> to vector<1x512xf32>
    %17 = vector.extract_strided_slice %12 {offsets = [0, 0], sizes = [1, 16], strides = [1, 1]} : vector<1x128xf32> to vector<1x16xf32>
    %cst_14 = arith.constant dense<0.000000e+00> : vector<1x512xf32>
    %18 = tpu.matmul %17, %1, %cst_14 {dimension_numbers = #tpu.dot_dimension_numbers<[1], [0], [0], [1], [0, 0, 1, 1], [], []>} : vector<1x16xf32>, vector<16x512xf32>, vector<1x512xf32> -> vector<1x512xf32>
    %19 = arith.addf %16, %18 : vector<1x512xf32>
    %20 = vector.extract_strided_slice %19 {offsets = [0, 0], sizes = [1, 128], strides = [1, 1]} : vector<1x512xf32> to vector<1x128xf32>
    %cst_15 = arith.constant 5.000000e-01 : f32
    %21 = vector.broadcast %cst_15 : f32 to vector<1x128xf32>
    %22 = arith.mulf %21, %20 : vector<1x128xf32>
    %23 = math.tanh %22 : vector<1x128xf32>
    %cst_16 = arith.constant 5.000000e-01 : f32
    %24 = vector.broadcast %cst_16 : f32 to vector<1x128xf32>
    %25 = arith.mulf %24, %23 : vector<1x128xf32>
    %cst_17 = arith.constant 5.000000e-01 : f32
    %26 = vector.broadcast %cst_17 : f32 to vector<1x128xf32>
    %27 = arith.addf %25, %26 : vector<1x128xf32>
    %28 = vector.extract_strided_slice %19 {offsets = [0, 128], sizes = [1, 128], strides = [1, 1]} : vector<1x512xf32> to vector<1x128xf32>
    %cst_18 = arith.constant 5.000000e-01 : f32
    %29 = vector.broadcast %cst_18 : f32 to vector<1x128xf32>
    %30 = arith.mulf %29, %28 : vector<1x128xf32>
    %31 = math.tanh %30 : vector<1x128xf32>
    %cst_19 = arith.constant 5.000000e-01 : f32
    %32 = vector.broadcast %cst_19 : f32 to vector<1x128xf32>
    %33 = arith.mulf %32, %31 : vector<1x128xf32>
    %cst_20 = arith.constant 5.000000e-01 : f32
    %34 = vector.broadcast %cst_20 : f32 to vector<1x128xf32>
    %35 = arith.addf %33, %34 : vector<1x128xf32>
    %36 = vector.extract_strided_slice %19 {offsets = [0, 256], sizes = [1, 128], strides = [1, 1]} : vector<1x512xf32> to vector<1x128xf32>
    %37 = math.tanh %36 : vector<1x128xf32>
    %38 = vector.extract_strided_slice %19 {offsets = [0, 384], sizes = [1, 128], strides = [1, 1]} : vector<1x512xf32> to vector<1x128xf32>
    %cst_21 = arith.constant 5.000000e-01 : f32
    %39 = vector.broadcast %cst_21 : f32 to vector<1x128xf32>
    %40 = arith.mulf %39, %38 : vector<1x128xf32>
    %41 = math.tanh %40 : vector<1x128xf32>
    %cst_22 = arith.constant 5.000000e-01 : f32
    %42 = vector.broadcast %cst_22 : f32 to vector<1x128xf32>
    %43 = arith.mulf %42, %41 : vector<1x128xf32>
    %cst_23 = arith.constant 5.000000e-01 : f32
    %44 = vector.broadcast %cst_23 : f32 to vector<1x128xf32>
    %45 = arith.addf %43, %44 : vector<1x128xf32>
    %46 = arith.mulf %35, %13 : vector<1x128xf32>
    %47 = arith.mulf %27, %37 : vector<1x128xf32>
    %48 = arith.addf %46, %47 : vector<1x128xf32>
    %49 = math.tanh %48 : vector<1x128xf32>
    %50 = arith.mulf %45, %49 : vector<1x128xf32>
    %51 = vector.extract_strided_slice %50 {offsets = [0, 0], sizes = [1, 16], strides = [1, 1]} : vector<1x128xf32> to vector<1x16xf32>
    %cst_24 = arith.constant dense<0.000000e+00> : vector<1x512xf32>
    %52 = tpu.matmul %51, %3, %cst_24 {dimension_numbers = #tpu.dot_dimension_numbers<[1], [0], [0], [1], [0, 0, 1, 1], [], []>} : vector<1x16xf32>, vector<16x512xf32>, vector<1x512xf32> -> vector<1x512xf32>
    %53 = vector.extract_strided_slice %14 {offsets = [0, 0], sizes = [1, 32], strides = [1, 1]} : vector<1x128xf32> to vector<1x32xf32>
    %cst_25 = arith.constant dense<0.000000e+00> : vector<1x512xf32>
    %54 = tpu.matmul %53, %4, %cst_25 {dimension_numbers = #tpu.dot_dimension_numbers<[1], [0], [0], [1], [0, 0, 1, 1], [], []>} : vector<1x32xf32>, vector<32x512xf32>, vector<1x512xf32> -> vector<1x512xf32>
    %55 = arith.addf %52, %54 : vector<1x512xf32>
    %56 = arith.addf %55, %5 : vector<1x512xf32>
    %57 = vector.extract_strided_slice %56 {offsets = [0, 0], sizes = [1, 128], strides = [1, 1]} : vector<1x512xf32> to vector<1x128xf32>
    %cst_26 = arith.constant 5.000000e-01 : f32
    %58 = vector.broadcast %cst_26 : f32 to vector<1x128xf32>
    %59 = arith.mulf %58, %57 : vector<1x128xf32>
    %60 = math.tanh %59 : vector<1x128xf32>
    %cst_27 = arith.constant 5.000000e-01 : f32
    %61 = vector.broadcast %cst_27 : f32 to vector<1x128xf32>
    %62 = arith.mulf %61, %60 : vector<1x128xf32>
    %cst_28 = arith.constant 5.000000e-01 : f32
    %63 = vector.broadcast %cst_28 : f32 to vector<1x128xf32>
    %64 = arith.addf %62, %63 : vector<1x128xf32>
    %65 = vector.extract_strided_slice %56 {offsets = [0, 128], sizes = [1, 128], strides = [1, 1]} : vector<1x512xf32> to vector<1x128xf32>
    %cst_29 = arith.constant 5.000000e-01 : f32
    %66 = vector.broadcast %cst_29 : f32 to vector<1x128xf32>
    %67 = arith.mulf %66, %65 : vector<1x128xf32>
    %68 = math.tanh %67 : vector<1x128xf32>
    %cst_30 = arith.constant 5.000000e-01 : f32
    %69 = vector.broadcast %cst_30 : f32 to vector<1x128xf32>
    %70 = arith.mulf %69, %68 : vector<1x128xf32>
    %cst_31 = arith.constant 5.000000e-01 : f32
    %71 = vector.broadcast %cst_31 : f32 to vector<1x128xf32>
    %72 = arith.addf %70, %71 : vector<1x128xf32>
    %73 = vector.extract_strided_slice %56 {offsets = [0, 256], sizes = [1, 128], strides = [1, 1]} : vector<1x512xf32> to vector<1x128xf32>
    %74 = math.tanh %73 : vector<1x128xf32>
    %75 = vector.extract_strided_slice %56 {offsets = [0, 384], sizes = [1, 128], strides = [1, 1]} : vector<1x512xf32> to vector<1x128xf32>
    %cst_32 = arith.constant 5.000000e-01 : f32
    %76 = vector.broadcast %cst_32 : f32 to vector<1x128xf32>
    %77 = arith.mulf %76, %75 : vector<1x128xf32>
    %78 = math.tanh %77 : vector<1x128xf32>
    %cst_33 = arith.constant 5.000000e-01 : f32
    %79 = vector.broadcast %cst_33 : f32 to vector<1x128xf32>
    %80 = arith.mulf %79, %78 : vector<1x128xf32>
    %cst_34 = arith.constant 5.000000e-01 : f32
    %81 = vector.broadcast %cst_34 : f32 to vector<1x128xf32>
    %82 = arith.addf %80, %81 : vector<1x128xf32>
    %83 = arith.mulf %72, %15 : vector<1x128xf32>
    %84 = arith.mulf %64, %74 : vector<1x128xf32>
    %85 = arith.addf %83, %84 : vector<1x128xf32>
    %86 = math.tanh %85 : vector<1x128xf32>
    %87 = arith.mulf %82, %86 : vector<1x128xf32>
    %88 = vector.extract_strided_slice %11 {offsets = [1, 0], sizes = [1, 512], strides = [1, 1]} : vector<8x512xf32> to vector<1x512xf32>
    %89 = vector.extract_strided_slice %50 {offsets = [0, 0], sizes = [1, 16], strides = [1, 1]} : vector<1x128xf32> to vector<1x16xf32>
    %cst_35 = arith.constant dense<0.000000e+00> : vector<1x512xf32>
    %90 = tpu.matmul %89, %1, %cst_35 {dimension_numbers = #tpu.dot_dimension_numbers<[1], [0], [0], [1], [0, 0, 1, 1], [], []>} : vector<1x16xf32>, vector<16x512xf32>, vector<1x512xf32> -> vector<1x512xf32>
    %91 = arith.addf %88, %90 : vector<1x512xf32>
    %92 = vector.extract_strided_slice %91 {offsets = [0, 0], sizes = [1, 128], strides = [1, 1]} : vector<1x512xf32> to vector<1x128xf32>
    %cst_36 = arith.constant 5.000000e-01 : f32
    %93 = vector.broadcast %cst_36 : f32 to vector<1x128xf32>
    %94 = arith.mulf %93, %92 : vector<1x128xf32>
    %95 = math.tanh %94 : vector<1x128xf32>
    %cst_37 = arith.constant 5.000000e-01 : f32
    %96 = vector.broadcast %cst_37 : f32 to vector<1x128xf32>
    %97 = arith.mulf %96, %95 : vector<1x128xf32>
    %cst_38 = arith.constant 5.000000e-01 : f32
    %98 = vector.broadcast %cst_38 : f32 to vector<1x128xf32>
    %99 = arith.addf %97, %98 : vector<1x128xf32>
    %100 = vector.extract_strided_slice %91 {offsets = [0, 128], sizes = [1, 128], strides = [1, 1]} : vector<1x512xf32> to vector<1x128xf32>
    %cst_39 = arith.constant 5.000000e-01 : f32
    %101 = vector.broadcast %cst_39 : f32 to vector<1x128xf32>
    %102 = arith.mulf %101, %100 : vector<1x128xf32>
    %103 = math.tanh %102 : vector<1x128xf32>
    %cst_40 = arith.constant 5.000000e-01 : f32
    %104 = vector.broadcast %cst_40 : f32 to vector<1x128xf32>
    %105 = arith.mulf %104, %103 : vector<1x128xf32>
    %cst_41 = arith.constant 5.000000e-01 : f32
    %106 = vector.broadcast %cst_41 : f32 to vector<1x128xf32>
    %107 = arith.addf %105, %106 : vector<1x128xf32>
    %108 = vector.extract_strided_slice %91 {offsets = [0, 256], sizes = [1, 128], strides = [1, 1]} : vector<1x512xf32> to vector<1x128xf32>
    %109 = math.tanh %108 : vector<1x128xf32>
    %110 = vector.extract_strided_slice %91 {offsets = [0, 384], sizes = [1, 128], strides = [1, 1]} : vector<1x512xf32> to vector<1x128xf32>
    %cst_42 = arith.constant 5.000000e-01 : f32
    %111 = vector.broadcast %cst_42 : f32 to vector<1x128xf32>
    %112 = arith.mulf %111, %110 : vector<1x128xf32>
    %113 = math.tanh %112 : vector<1x128xf32>
    %cst_43 = arith.constant 5.000000e-01 : f32
    %114 = vector.broadcast %cst_43 : f32 to vector<1x128xf32>
    %115 = arith.mulf %114, %113 : vector<1x128xf32>
    %cst_44 = arith.constant 5.000000e-01 : f32
    %116 = vector.broadcast %cst_44 : f32 to vector<1x128xf32>
    %117 = arith.addf %115, %116 : vector<1x128xf32>
    %118 = arith.mulf %107, %48 : vector<1x128xf32>
    %119 = arith.mulf %99, %109 : vector<1x128xf32>
    %120 = arith.addf %118, %119 : vector<1x128xf32>
    %121 = math.tanh %120 : vector<1x128xf32>
    %122 = arith.mulf %117, %121 : vector<1x128xf32>
    %123 = vector.extract_strided_slice %122 {offsets = [0, 0], sizes = [1, 16], strides = [1, 1]} : vector<1x128xf32> to vector<1x16xf32>
    %cst_45 = arith.constant dense<0.000000e+00> : vector<1x512xf32>
    %124 = tpu.matmul %123, %3, %cst_45 {dimension_numbers = #tpu.dot_dimension_numbers<[1], [0], [0], [1], [0, 0, 1, 1], [], []>} : vector<1x16xf32>, vector<16x512xf32>, vector<1x512xf32> -> vector<1x512xf32>
    %125 = vector.extract_strided_slice %87 {offsets = [0, 0], sizes = [1, 32], strides = [1, 1]} : vector<1x128xf32> to vector<1x32xf32>
    %cst_46 = arith.constant dense<0.000000e+00> : vector<1x512xf32>
    %126 = tpu.matmul %125, %4, %cst_46 {dimension_numbers = #tpu.dot_dimension_numbers<[1], [0], [0], [1], [0, 0, 1, 1], [], []>} : vector<1x32xf32>, vector<32x512xf32>, vector<1x512xf32> -> vector<1x512xf32>
    %127 = arith.addf %124, %126 : vector<1x512xf32>
    %128 = arith.addf %127, %5 : vector<1x512xf32>
    %129 = vector.extract_strided_slice %128 {offsets = [0, 0], sizes = [1, 128], strides = [1, 1]} : vector<1x512xf32> to vector<1x128xf32>
    %cst_47 = arith.constant 5.000000e-01 : f32
    %130 = vector.broadcast %cst_47 : f32 to vector<1x128xf32>
    %131 = arith.mulf %130, %129 : vector<1x128xf32>
    %132 = math.tanh %131 : vector<1x128xf32>
    %cst_48 = arith.constant 5.000000e-01 : f32
    %133 = vector.broadcast %cst_48 : f32 to vector<1x128xf32>
    %134 = arith.mulf %133, %132 : vector<1x128xf32>
    %cst_49 = arith.constant 5.000000e-01 : f32
    %135 = vector.broadcast %cst_49 : f32 to vector<1x128xf32>
    %136 = arith.addf %134, %135 : vector<1x128xf32>
    %137 = vector.extract_strided_slice %128 {offsets = [0, 128], sizes = [1, 128], strides = [1, 1]} : vector<1x512xf32> to vector<1x128xf32>
    %cst_50 = arith.constant 5.000000e-01 : f32
    %138 = vector.broadcast %cst_50 : f32 to vector<1x128xf32>
    %139 = arith.mulf %138, %137 : vector<1x128xf32>
    %140 = math.tanh %139 : vector<1x128xf32>
    %cst_51 = arith.constant 5.000000e-01 : f32
    %141 = vector.broadcast %cst_51 : f32 to vector<1x128xf32>
    %142 = arith.mulf %141, %140 : vector<1x128xf32>
    %cst_52 = arith.constant 5.000000e-01 : f32
    %143 = vector.broadcast %cst_52 : f32 to vector<1x128xf32>
    %144 = arith.addf %142, %143 : vector<1x128xf32>
    %145 = vector.extract_strided_slice %128 {offsets = [0, 256], sizes = [1, 128], strides = [1, 1]} : vector<1x512xf32> to vector<1x128xf32>
    %146 = math.tanh %145 : vector<1x128xf32>
    %147 = vector.extract_strided_slice %128 {offsets = [0, 384], sizes = [1, 128], strides = [1, 1]} : vector<1x512xf32> to vector<1x128xf32>
    %cst_53 = arith.constant 5.000000e-01 : f32
    %148 = vector.broadcast %cst_53 : f32 to vector<1x128xf32>
    %149 = arith.mulf %148, %147 : vector<1x128xf32>
    %150 = math.tanh %149 : vector<1x128xf32>
    %cst_54 = arith.constant 5.000000e-01 : f32
    %151 = vector.broadcast %cst_54 : f32 to vector<1x128xf32>
    %152 = arith.mulf %151, %150 : vector<1x128xf32>
    %cst_55 = arith.constant 5.000000e-01 : f32
    %153 = vector.broadcast %cst_55 : f32 to vector<1x128xf32>
    %154 = arith.addf %152, %153 : vector<1x128xf32>
    %155 = arith.mulf %144, %85 : vector<1x128xf32>
    %156 = arith.mulf %136, %146 : vector<1x128xf32>
    %157 = arith.addf %155, %156 : vector<1x128xf32>
    %158 = math.tanh %157 : vector<1x128xf32>
    %159 = arith.mulf %154, %158 : vector<1x128xf32>
    %160 = vector.extract_strided_slice %11 {offsets = [2, 0], sizes = [1, 512], strides = [1, 1]} : vector<8x512xf32> to vector<1x512xf32>
    %161 = vector.extract_strided_slice %122 {offsets = [0, 0], sizes = [1, 16], strides = [1, 1]} : vector<1x128xf32> to vector<1x16xf32>
    %cst_56 = arith.constant dense<0.000000e+00> : vector<1x512xf32>
    %162 = tpu.matmul %161, %1, %cst_56 {dimension_numbers = #tpu.dot_dimension_numbers<[1], [0], [0], [1], [0, 0, 1, 1], [], []>} : vector<1x16xf32>, vector<16x512xf32>, vector<1x512xf32> -> vector<1x512xf32>
    %163 = arith.addf %160, %162 : vector<1x512xf32>
    %164 = vector.extract_strided_slice %163 {offsets = [0, 0], sizes = [1, 128], strides = [1, 1]} : vector<1x512xf32> to vector<1x128xf32>
    %cst_57 = arith.constant 5.000000e-01 : f32
    %165 = vector.broadcast %cst_57 : f32 to vector<1x128xf32>
    %166 = arith.mulf %165, %164 : vector<1x128xf32>
    %167 = math.tanh %166 : vector<1x128xf32>
    %cst_58 = arith.constant 5.000000e-01 : f32
    %168 = vector.broadcast %cst_58 : f32 to vector<1x128xf32>
    %169 = arith.mulf %168, %167 : vector<1x128xf32>
    %cst_59 = arith.constant 5.000000e-01 : f32
    %170 = vector.broadcast %cst_59 : f32 to vector<1x128xf32>
    %171 = arith.addf %169, %170 : vector<1x128xf32>
    %172 = vector.extract_strided_slice %163 {offsets = [0, 128], sizes = [1, 128], strides = [1, 1]} : vector<1x512xf32> to vector<1x128xf32>
    %cst_60 = arith.constant 5.000000e-01 : f32
    %173 = vector.broadcast %cst_60 : f32 to vector<1x128xf32>
    %174 = arith.mulf %173, %172 : vector<1x128xf32>
    %175 = math.tanh %174 : vector<1x128xf32>
    %cst_61 = arith.constant 5.000000e-01 : f32
    %176 = vector.broadcast %cst_61 : f32 to vector<1x128xf32>
    %177 = arith.mulf %176, %175 : vector<1x128xf32>
    %cst_62 = arith.constant 5.000000e-01 : f32
    %178 = vector.broadcast %cst_62 : f32 to vector<1x128xf32>
    %179 = arith.addf %177, %178 : vector<1x128xf32>
    %180 = vector.extract_strided_slice %163 {offsets = [0, 256], sizes = [1, 128], strides = [1, 1]} : vector<1x512xf32> to vector<1x128xf32>
    %181 = math.tanh %180 : vector<1x128xf32>
    %182 = vector.extract_strided_slice %163 {offsets = [0, 384], sizes = [1, 128], strides = [1, 1]} : vector<1x512xf32> to vector<1x128xf32>
    %cst_63 = arith.constant 5.000000e-01 : f32
    %183 = vector.broadcast %cst_63 : f32 to vector<1x128xf32>
    %184 = arith.mulf %183, %182 : vector<1x128xf32>
    %185 = math.tanh %184 : vector<1x128xf32>
    %cst_64 = arith.constant 5.000000e-01 : f32
    %186 = vector.broadcast %cst_64 : f32 to vector<1x128xf32>
    %187 = arith.mulf %186, %185 : vector<1x128xf32>
    %cst_65 = arith.constant 5.000000e-01 : f32
    %188 = vector.broadcast %cst_65 : f32 to vector<1x128xf32>
    %189 = arith.addf %187, %188 : vector<1x128xf32>
    %190 = arith.mulf %179, %120 : vector<1x128xf32>
    %191 = arith.mulf %171, %181 : vector<1x128xf32>
    %192 = arith.addf %190, %191 : vector<1x128xf32>
    %193 = math.tanh %192 : vector<1x128xf32>
    %194 = arith.mulf %189, %193 : vector<1x128xf32>
    %195 = vector.extract_strided_slice %194 {offsets = [0, 0], sizes = [1, 16], strides = [1, 1]} : vector<1x128xf32> to vector<1x16xf32>
    %cst_66 = arith.constant dense<0.000000e+00> : vector<1x512xf32>
    %196 = tpu.matmul %195, %3, %cst_66 {dimension_numbers = #tpu.dot_dimension_numbers<[1], [0], [0], [1], [0, 0, 1, 1], [], []>} : vector<1x16xf32>, vector<16x512xf32>, vector<1x512xf32> -> vector<1x512xf32>
    %197 = vector.extract_strided_slice %159 {offsets = [0, 0], sizes = [1, 32], strides = [1, 1]} : vector<1x128xf32> to vector<1x32xf32>
    %cst_67 = arith.constant dense<0.000000e+00> : vector<1x512xf32>
    %198 = tpu.matmul %197, %4, %cst_67 {dimension_numbers = #tpu.dot_dimension_numbers<[1], [0], [0], [1], [0, 0, 1, 1], [], []>} : vector<1x32xf32>, vector<32x512xf32>, vector<1x512xf32> -> vector<1x512xf32>
    %199 = arith.addf %196, %198 : vector<1x512xf32>
    %200 = arith.addf %199, %5 : vector<1x512xf32>
    %201 = vector.extract_strided_slice %200 {offsets = [0, 0], sizes = [1, 128], strides = [1, 1]} : vector<1x512xf32> to vector<1x128xf32>
    %cst_68 = arith.constant 5.000000e-01 : f32
    %202 = vector.broadcast %cst_68 : f32 to vector<1x128xf32>
    %203 = arith.mulf %202, %201 : vector<1x128xf32>
    %204 = math.tanh %203 : vector<1x128xf32>
    %cst_69 = arith.constant 5.000000e-01 : f32
    %205 = vector.broadcast %cst_69 : f32 to vector<1x128xf32>
    %206 = arith.mulf %205, %204 : vector<1x128xf32>
    %cst_70 = arith.constant 5.000000e-01 : f32
    %207 = vector.broadcast %cst_70 : f32 to vector<1x128xf32>
    %208 = arith.addf %206, %207 : vector<1x128xf32>
    %209 = vector.extract_strided_slice %200 {offsets = [0, 128], sizes = [1, 128], strides = [1, 1]} : vector<1x512xf32> to vector<1x128xf32>
    %cst_71 = arith.constant 5.000000e-01 : f32
    %210 = vector.broadcast %cst_71 : f32 to vector<1x128xf32>
    %211 = arith.mulf %210, %209 : vector<1x128xf32>
    %212 = math.tanh %211 : vector<1x128xf32>
    %cst_72 = arith.constant 5.000000e-01 : f32
    %213 = vector.broadcast %cst_72 : f32 to vector<1x128xf32>
    %214 = arith.mulf %213, %212 : vector<1x128xf32>
    %cst_73 = arith.constant 5.000000e-01 : f32
    %215 = vector.broadcast %cst_73 : f32 to vector<1x128xf32>
    %216 = arith.addf %214, %215 : vector<1x128xf32>
    %217 = vector.extract_strided_slice %200 {offsets = [0, 256], sizes = [1, 128], strides = [1, 1]} : vector<1x512xf32> to vector<1x128xf32>
    %218 = math.tanh %217 : vector<1x128xf32>
    %219 = vector.extract_strided_slice %200 {offsets = [0, 384], sizes = [1, 128], strides = [1, 1]} : vector<1x512xf32> to vector<1x128xf32>
    %cst_74 = arith.constant 5.000000e-01 : f32
    %220 = vector.broadcast %cst_74 : f32 to vector<1x128xf32>
    %221 = arith.mulf %220, %219 : vector<1x128xf32>
    %222 = math.tanh %221 : vector<1x128xf32>
    %cst_75 = arith.constant 5.000000e-01 : f32
    %223 = vector.broadcast %cst_75 : f32 to vector<1x128xf32>
    %224 = arith.mulf %223, %222 : vector<1x128xf32>
    %cst_76 = arith.constant 5.000000e-01 : f32
    %225 = vector.broadcast %cst_76 : f32 to vector<1x128xf32>
    %226 = arith.addf %224, %225 : vector<1x128xf32>
    %227 = arith.mulf %216, %157 : vector<1x128xf32>
    %228 = arith.mulf %208, %218 : vector<1x128xf32>
    %229 = arith.addf %227, %228 : vector<1x128xf32>
    %230 = math.tanh %229 : vector<1x128xf32>
    %231 = arith.mulf %226, %230 : vector<1x128xf32>
    %232 = vector.extract_strided_slice %11 {offsets = [3, 0], sizes = [1, 512], strides = [1, 1]} : vector<8x512xf32> to vector<1x512xf32>
    %233 = vector.extract_strided_slice %194 {offsets = [0, 0], sizes = [1, 16], strides = [1, 1]} : vector<1x128xf32> to vector<1x16xf32>
    %cst_77 = arith.constant dense<0.000000e+00> : vector<1x512xf32>
    %234 = tpu.matmul %233, %1, %cst_77 {dimension_numbers = #tpu.dot_dimension_numbers<[1], [0], [0], [1], [0, 0, 1, 1], [], []>} : vector<1x16xf32>, vector<16x512xf32>, vector<1x512xf32> -> vector<1x512xf32>
    %235 = arith.addf %232, %234 : vector<1x512xf32>
    %236 = vector.extract_strided_slice %235 {offsets = [0, 0], sizes = [1, 128], strides = [1, 1]} : vector<1x512xf32> to vector<1x128xf32>
    %cst_78 = arith.constant 5.000000e-01 : f32
    %237 = vector.broadcast %cst_78 : f32 to vector<1x128xf32>
    %238 = arith.mulf %237, %236 : vector<1x128xf32>
    %239 = math.tanh %238 : vector<1x128xf32>
    %cst_79 = arith.constant 5.000000e-01 : f32
    %240 = vector.broadcast %cst_79 : f32 to vector<1x128xf32>
    %241 = arith.mulf %240, %239 : vector<1x128xf32>
    %cst_80 = arith.constant 5.000000e-01 : f32
    %242 = vector.broadcast %cst_80 : f32 to vector<1x128xf32>
    %243 = arith.addf %241, %242 : vector<1x128xf32>
    %244 = vector.extract_strided_slice %235 {offsets = [0, 128], sizes = [1, 128], strides = [1, 1]} : vector<1x512xf32> to vector<1x128xf32>
    %cst_81 = arith.constant 5.000000e-01 : f32
    %245 = vector.broadcast %cst_81 : f32 to vector<1x128xf32>
    %246 = arith.mulf %245, %244 : vector<1x128xf32>
    %247 = math.tanh %246 : vector<1x128xf32>
    %cst_82 = arith.constant 5.000000e-01 : f32
    %248 = vector.broadcast %cst_82 : f32 to vector<1x128xf32>
    %249 = arith.mulf %248, %247 : vector<1x128xf32>
    %cst_83 = arith.constant 5.000000e-01 : f32
    %250 = vector.broadcast %cst_83 : f32 to vector<1x128xf32>
    %251 = arith.addf %249, %250 : vector<1x128xf32>
    %252 = vector.extract_strided_slice %235 {offsets = [0, 256], sizes = [1, 128], strides = [1, 1]} : vector<1x512xf32> to vector<1x128xf32>
    %253 = math.tanh %252 : vector<1x128xf32>
    %254 = vector.extract_strided_slice %235 {offsets = [0, 384], sizes = [1, 128], strides = [1, 1]} : vector<1x512xf32> to vector<1x128xf32>
    %cst_84 = arith.constant 5.000000e-01 : f32
    %255 = vector.broadcast %cst_84 : f32 to vector<1x128xf32>
    %256 = arith.mulf %255, %254 : vector<1x128xf32>
    %257 = math.tanh %256 : vector<1x128xf32>
    %cst_85 = arith.constant 5.000000e-01 : f32
    %258 = vector.broadcast %cst_85 : f32 to vector<1x128xf32>
    %259 = arith.mulf %258, %257 : vector<1x128xf32>
    %cst_86 = arith.constant 5.000000e-01 : f32
    %260 = vector.broadcast %cst_86 : f32 to vector<1x128xf32>
    %261 = arith.addf %259, %260 : vector<1x128xf32>
    %262 = arith.mulf %251, %192 : vector<1x128xf32>
    %263 = arith.mulf %243, %253 : vector<1x128xf32>
    %264 = arith.addf %262, %263 : vector<1x128xf32>
    %265 = math.tanh %264 : vector<1x128xf32>
    %266 = arith.mulf %261, %265 : vector<1x128xf32>
    %267 = vector.extract_strided_slice %266 {offsets = [0, 0], sizes = [1, 16], strides = [1, 1]} : vector<1x128xf32> to vector<1x16xf32>
    %cst_87 = arith.constant dense<0.000000e+00> : vector<1x512xf32>
    %268 = tpu.matmul %267, %3, %cst_87 {dimension_numbers = #tpu.dot_dimension_numbers<[1], [0], [0], [1], [0, 0, 1, 1], [], []>} : vector<1x16xf32>, vector<16x512xf32>, vector<1x512xf32> -> vector<1x512xf32>
    %269 = vector.extract_strided_slice %231 {offsets = [0, 0], sizes = [1, 32], strides = [1, 1]} : vector<1x128xf32> to vector<1x32xf32>
    %cst_88 = arith.constant dense<0.000000e+00> : vector<1x512xf32>
    %270 = tpu.matmul %269, %4, %cst_88 {dimension_numbers = #tpu.dot_dimension_numbers<[1], [0], [0], [1], [0, 0, 1, 1], [], []>} : vector<1x32xf32>, vector<32x512xf32>, vector<1x512xf32> -> vector<1x512xf32>
    %271 = arith.addf %268, %270 : vector<1x512xf32>
    %272 = arith.addf %271, %5 : vector<1x512xf32>
    %273 = vector.extract_strided_slice %272 {offsets = [0, 0], sizes = [1, 128], strides = [1, 1]} : vector<1x512xf32> to vector<1x128xf32>
    %cst_89 = arith.constant 5.000000e-01 : f32
    %274 = vector.broadcast %cst_89 : f32 to vector<1x128xf32>
    %275 = arith.mulf %274, %273 : vector<1x128xf32>
    %276 = math.tanh %275 : vector<1x128xf32>
    %cst_90 = arith.constant 5.000000e-01 : f32
    %277 = vector.broadcast %cst_90 : f32 to vector<1x128xf32>
    %278 = arith.mulf %277, %276 : vector<1x128xf32>
    %cst_91 = arith.constant 5.000000e-01 : f32
    %279 = vector.broadcast %cst_91 : f32 to vector<1x128xf32>
    %280 = arith.addf %278, %279 : vector<1x128xf32>
    %281 = vector.extract_strided_slice %272 {offsets = [0, 128], sizes = [1, 128], strides = [1, 1]} : vector<1x512xf32> to vector<1x128xf32>
    %cst_92 = arith.constant 5.000000e-01 : f32
    %282 = vector.broadcast %cst_92 : f32 to vector<1x128xf32>
    %283 = arith.mulf %282, %281 : vector<1x128xf32>
    %284 = math.tanh %283 : vector<1x128xf32>
    %cst_93 = arith.constant 5.000000e-01 : f32
    %285 = vector.broadcast %cst_93 : f32 to vector<1x128xf32>
    %286 = arith.mulf %285, %284 : vector<1x128xf32>
    %cst_94 = arith.constant 5.000000e-01 : f32
    %287 = vector.broadcast %cst_94 : f32 to vector<1x128xf32>
    %288 = arith.addf %286, %287 : vector<1x128xf32>
    %289 = vector.extract_strided_slice %272 {offsets = [0, 256], sizes = [1, 128], strides = [1, 1]} : vector<1x512xf32> to vector<1x128xf32>
    %290 = math.tanh %289 : vector<1x128xf32>
    %291 = vector.extract_strided_slice %272 {offsets = [0, 384], sizes = [1, 128], strides = [1, 1]} : vector<1x512xf32> to vector<1x128xf32>
    %cst_95 = arith.constant 5.000000e-01 : f32
    %292 = vector.broadcast %cst_95 : f32 to vector<1x128xf32>
    %293 = arith.mulf %292, %291 : vector<1x128xf32>
    %294 = math.tanh %293 : vector<1x128xf32>
    %cst_96 = arith.constant 5.000000e-01 : f32
    %295 = vector.broadcast %cst_96 : f32 to vector<1x128xf32>
    %296 = arith.mulf %295, %294 : vector<1x128xf32>
    %cst_97 = arith.constant 5.000000e-01 : f32
    %297 = vector.broadcast %cst_97 : f32 to vector<1x128xf32>
    %298 = arith.addf %296, %297 : vector<1x128xf32>
    %299 = arith.mulf %288, %229 : vector<1x128xf32>
    %300 = arith.mulf %280, %290 : vector<1x128xf32>
    %301 = arith.addf %299, %300 : vector<1x128xf32>
    %302 = math.tanh %301 : vector<1x128xf32>
    %303 = arith.mulf %298, %302 : vector<1x128xf32>
    %304 = vector.extract_strided_slice %11 {offsets = [4, 0], sizes = [1, 512], strides = [1, 1]} : vector<8x512xf32> to vector<1x512xf32>
    %305 = vector.extract_strided_slice %266 {offsets = [0, 0], sizes = [1, 16], strides = [1, 1]} : vector<1x128xf32> to vector<1x16xf32>
    %cst_98 = arith.constant dense<0.000000e+00> : vector<1x512xf32>
    %306 = tpu.matmul %305, %1, %cst_98 {dimension_numbers = #tpu.dot_dimension_numbers<[1], [0], [0], [1], [0, 0, 1, 1], [], []>} : vector<1x16xf32>, vector<16x512xf32>, vector<1x512xf32> -> vector<1x512xf32>
    %307 = arith.addf %304, %306 : vector<1x512xf32>
    %308 = vector.extract_strided_slice %307 {offsets = [0, 0], sizes = [1, 128], strides = [1, 1]} : vector<1x512xf32> to vector<1x128xf32>
    %cst_99 = arith.constant 5.000000e-01 : f32
    %309 = vector.broadcast %cst_99 : f32 to vector<1x128xf32>
    %310 = arith.mulf %309, %308 : vector<1x128xf32>
    %311 = math.tanh %310 : vector<1x128xf32>
    %cst_100 = arith.constant 5.000000e-01 : f32
    %312 = vector.broadcast %cst_100 : f32 to vector<1x128xf32>
    %313 = arith.mulf %312, %311 : vector<1x128xf32>
    %cst_101 = arith.constant 5.000000e-01 : f32
    %314 = vector.broadcast %cst_101 : f32 to vector<1x128xf32>
    %315 = arith.addf %313, %314 : vector<1x128xf32>
    %316 = vector.extract_strided_slice %307 {offsets = [0, 128], sizes = [1, 128], strides = [1, 1]} : vector<1x512xf32> to vector<1x128xf32>
    %cst_102 = arith.constant 5.000000e-01 : f32
    %317 = vector.broadcast %cst_102 : f32 to vector<1x128xf32>
    %318 = arith.mulf %317, %316 : vector<1x128xf32>
    %319 = math.tanh %318 : vector<1x128xf32>
    %cst_103 = arith.constant 5.000000e-01 : f32
    %320 = vector.broadcast %cst_103 : f32 to vector<1x128xf32>
    %321 = arith.mulf %320, %319 : vector<1x128xf32>
    %cst_104 = arith.constant 5.000000e-01 : f32
    %322 = vector.broadcast %cst_104 : f32 to vector<1x128xf32>
    %323 = arith.addf %321, %322 : vector<1x128xf32>
    %324 = vector.extract_strided_slice %307 {offsets = [0, 256], sizes = [1, 128], strides = [1, 1]} : vector<1x512xf32> to vector<1x128xf32>
    %325 = math.tanh %324 : vector<1x128xf32>
    %326 = vector.extract_strided_slice %307 {offsets = [0, 384], sizes = [1, 128], strides = [1, 1]} : vector<1x512xf32> to vector<1x128xf32>
    %cst_105 = arith.constant 5.000000e-01 : f32
    %327 = vector.broadcast %cst_105 : f32 to vector<1x128xf32>
    %328 = arith.mulf %327, %326 : vector<1x128xf32>
    %329 = math.tanh %328 : vector<1x128xf32>
    %cst_106 = arith.constant 5.000000e-01 : f32
    %330 = vector.broadcast %cst_106 : f32 to vector<1x128xf32>
    %331 = arith.mulf %330, %329 : vector<1x128xf32>
    %cst_107 = arith.constant 5.000000e-01 : f32
    %332 = vector.broadcast %cst_107 : f32 to vector<1x128xf32>
    %333 = arith.addf %331, %332 : vector<1x128xf32>
    %334 = arith.mulf %323, %264 : vector<1x128xf32>
    %335 = arith.mulf %315, %325 : vector<1x128xf32>
    %336 = arith.addf %334, %335 : vector<1x128xf32>
    %337 = math.tanh %336 : vector<1x128xf32>
    %338 = arith.mulf %333, %337 : vector<1x128xf32>
    %339 = vector.extract_strided_slice %338 {offsets = [0, 0], sizes = [1, 16], strides = [1, 1]} : vector<1x128xf32> to vector<1x16xf32>
    %cst_108 = arith.constant dense<0.000000e+00> : vector<1x512xf32>
    %340 = tpu.matmul %339, %3, %cst_108 {dimension_numbers = #tpu.dot_dimension_numbers<[1], [0], [0], [1], [0, 0, 1, 1], [], []>} : vector<1x16xf32>, vector<16x512xf32>, vector<1x512xf32> -> vector<1x512xf32>
    %341 = vector.extract_strided_slice %303 {offsets = [0, 0], sizes = [1, 32], strides = [1, 1]} : vector<1x128xf32> to vector<1x32xf32>
    %cst_109 = arith.constant dense<0.000000e+00> : vector<1x512xf32>
    %342 = tpu.matmul %341, %4, %cst_109 {dimension_numbers = #tpu.dot_dimension_numbers<[1], [0], [0], [1], [0, 0, 1, 1], [], []>} : vector<1x32xf32>, vector<32x512xf32>, vector<1x512xf32> -> vector<1x512xf32>
    %343 = arith.addf %340, %342 : vector<1x512xf32>
    %344 = arith.addf %343, %5 : vector<1x512xf32>
    %345 = vector.extract_strided_slice %344 {offsets = [0, 0], sizes = [1, 128], strides = [1, 1]} : vector<1x512xf32> to vector<1x128xf32>
    %cst_110 = arith.constant 5.000000e-01 : f32
    %346 = vector.broadcast %cst_110 : f32 to vector<1x128xf32>
    %347 = arith.mulf %346, %345 : vector<1x128xf32>
    %348 = math.tanh %347 : vector<1x128xf32>
    %cst_111 = arith.constant 5.000000e-01 : f32
    %349 = vector.broadcast %cst_111 : f32 to vector<1x128xf32>
    %350 = arith.mulf %349, %348 : vector<1x128xf32>
    %cst_112 = arith.constant 5.000000e-01 : f32
    %351 = vector.broadcast %cst_112 : f32 to vector<1x128xf32>
    %352 = arith.addf %350, %351 : vector<1x128xf32>
    %353 = vector.extract_strided_slice %344 {offsets = [0, 128], sizes = [1, 128], strides = [1, 1]} : vector<1x512xf32> to vector<1x128xf32>
    %cst_113 = arith.constant 5.000000e-01 : f32
    %354 = vector.broadcast %cst_113 : f32 to vector<1x128xf32>
    %355 = arith.mulf %354, %353 : vector<1x128xf32>
    %356 = math.tanh %355 : vector<1x128xf32>
    %cst_114 = arith.constant 5.000000e-01 : f32
    %357 = vector.broadcast %cst_114 : f32 to vector<1x128xf32>
    %358 = arith.mulf %357, %356 : vector<1x128xf32>
    %cst_115 = arith.constant 5.000000e-01 : f32
    %359 = vector.broadcast %cst_115 : f32 to vector<1x128xf32>
    %360 = arith.addf %358, %359 : vector<1x128xf32>
    %361 = vector.extract_strided_slice %344 {offsets = [0, 256], sizes = [1, 128], strides = [1, 1]} : vector<1x512xf32> to vector<1x128xf32>
    %362 = math.tanh %361 : vector<1x128xf32>
    %363 = vector.extract_strided_slice %344 {offsets = [0, 384], sizes = [1, 128], strides = [1, 1]} : vector<1x512xf32> to vector<1x128xf32>
    %cst_116 = arith.constant 5.000000e-01 : f32
    %364 = vector.broadcast %cst_116 : f32 to vector<1x128xf32>
    %365 = arith.mulf %364, %363 : vector<1x128xf32>
    %366 = math.tanh %365 : vector<1x128xf32>
    %cst_117 = arith.constant 5.000000e-01 : f32
    %367 = vector.broadcast %cst_117 : f32 to vector<1x128xf32>
    %368 = arith.mulf %367, %366 : vector<1x128xf32>
    %cst_118 = arith.constant 5.000000e-01 : f32
    %369 = vector.broadcast %cst_118 : f32 to vector<1x128xf32>
    %370 = arith.addf %368, %369 : vector<1x128xf32>
    %371 = arith.mulf %360, %301 : vector<1x128xf32>
    %372 = arith.mulf %352, %362 : vector<1x128xf32>
    %373 = arith.addf %371, %372 : vector<1x128xf32>
    %374 = math.tanh %373 : vector<1x128xf32>
    %375 = arith.mulf %370, %374 : vector<1x128xf32>
    %376 = vector.extract_strided_slice %11 {offsets = [5, 0], sizes = [1, 512], strides = [1, 1]} : vector<8x512xf32> to vector<1x512xf32>
    %377 = vector.extract_strided_slice %338 {offsets = [0, 0], sizes = [1, 16], strides = [1, 1]} : vector<1x128xf32> to vector<1x16xf32>
    %cst_119 = arith.constant dense<0.000000e+00> : vector<1x512xf32>
    %378 = tpu.matmul %377, %1, %cst_119 {dimension_numbers = #tpu.dot_dimension_numbers<[1], [0], [0], [1], [0, 0, 1, 1], [], []>} : vector<1x16xf32>, vector<16x512xf32>, vector<1x512xf32> -> vector<1x512xf32>
    %379 = arith.addf %376, %378 : vector<1x512xf32>
    %380 = vector.extract_strided_slice %379 {offsets = [0, 0], sizes = [1, 128], strides = [1, 1]} : vector<1x512xf32> to vector<1x128xf32>
    %cst_120 = arith.constant 5.000000e-01 : f32
    %381 = vector.broadcast %cst_120 : f32 to vector<1x128xf32>
    %382 = arith.mulf %381, %380 : vector<1x128xf32>
    %383 = math.tanh %382 : vector<1x128xf32>
    %cst_121 = arith.constant 5.000000e-01 : f32
    %384 = vector.broadcast %cst_121 : f32 to vector<1x128xf32>
    %385 = arith.mulf %384, %383 : vector<1x128xf32>
    %cst_122 = arith.constant 5.000000e-01 : f32
    %386 = vector.broadcast %cst_122 : f32 to vector<1x128xf32>
    %387 = arith.addf %385, %386 : vector<1x128xf32>
    %388 = vector.extract_strided_slice %379 {offsets = [0, 128], sizes = [1, 128], strides = [1, 1]} : vector<1x512xf32> to vector<1x128xf32>
    %cst_123 = arith.constant 5.000000e-01 : f32
    %389 = vector.broadcast %cst_123 : f32 to vector<1x128xf32>
    %390 = arith.mulf %389, %388 : vector<1x128xf32>
    %391 = math.tanh %390 : vector<1x128xf32>
    %cst_124 = arith.constant 5.000000e-01 : f32
    %392 = vector.broadcast %cst_124 : f32 to vector<1x128xf32>
    %393 = arith.mulf %392, %391 : vector<1x128xf32>
    %cst_125 = arith.constant 5.000000e-01 : f32
    %394 = vector.broadcast %cst_125 : f32 to vector<1x128xf32>
    %395 = arith.addf %393, %394 : vector<1x128xf32>
    %396 = vector.extract_strided_slice %379 {offsets = [0, 256], sizes = [1, 128], strides = [1, 1]} : vector<1x512xf32> to vector<1x128xf32>
    %397 = math.tanh %396 : vector<1x128xf32>
    %398 = vector.extract_strided_slice %379 {offsets = [0, 384], sizes = [1, 128], strides = [1, 1]} : vector<1x512xf32> to vector<1x128xf32>
    %cst_126 = arith.constant 5.000000e-01 : f32
    %399 = vector.broadcast %cst_126 : f32 to vector<1x128xf32>
    %400 = arith.mulf %399, %398 : vector<1x128xf32>
    %401 = math.tanh %400 : vector<1x128xf32>
    %cst_127 = arith.constant 5.000000e-01 : f32
    %402 = vector.broadcast %cst_127 : f32 to vector<1x128xf32>
    %403 = arith.mulf %402, %401 : vector<1x128xf32>
    %cst_128 = arith.constant 5.000000e-01 : f32
    %404 = vector.broadcast %cst_128 : f32 to vector<1x128xf32>
    %405 = arith.addf %403, %404 : vector<1x128xf32>
    %406 = arith.mulf %395, %336 : vector<1x128xf32>
    %407 = arith.mulf %387, %397 : vector<1x128xf32>
    %408 = arith.addf %406, %407 : vector<1x128xf32>
    %409 = math.tanh %408 : vector<1x128xf32>
    %410 = arith.mulf %405, %409 : vector<1x128xf32>
    %411 = vector.extract_strided_slice %410 {offsets = [0, 0], sizes = [1, 16], strides = [1, 1]} : vector<1x128xf32> to vector<1x16xf32>
    %cst_129 = arith.constant dense<0.000000e+00> : vector<1x512xf32>
    %412 = tpu.matmul %411, %3, %cst_129 {dimension_numbers = #tpu.dot_dimension_numbers<[1], [0], [0], [1], [0, 0, 1, 1], [], []>} : vector<1x16xf32>, vector<16x512xf32>, vector<1x512xf32> -> vector<1x512xf32>
    %413 = vector.extract_strided_slice %375 {offsets = [0, 0], sizes = [1, 32], strides = [1, 1]} : vector<1x128xf32> to vector<1x32xf32>
    %cst_130 = arith.constant dense<0.000000e+00> : vector<1x512xf32>
    %414 = tpu.matmul %413, %4, %cst_130 {dimension_numbers = #tpu.dot_dimension_numbers<[1], [0], [0], [1], [0, 0, 1, 1], [], []>} : vector<1x32xf32>, vector<32x512xf32>, vector<1x512xf32> -> vector<1x512xf32>
    %415 = arith.addf %412, %414 : vector<1x512xf32>
    %416 = arith.addf %415, %5 : vector<1x512xf32>
    %417 = vector.extract_strided_slice %416 {offsets = [0, 0], sizes = [1, 128], strides = [1, 1]} : vector<1x512xf32> to vector<1x128xf32>
    %cst_131 = arith.constant 5.000000e-01 : f32
    %418 = vector.broadcast %cst_131 : f32 to vector<1x128xf32>
    %419 = arith.mulf %418, %417 : vector<1x128xf32>
    %420 = math.tanh %419 : vector<1x128xf32>
    %cst_132 = arith.constant 5.000000e-01 : f32
    %421 = vector.broadcast %cst_132 : f32 to vector<1x128xf32>
    %422 = arith.mulf %421, %420 : vector<1x128xf32>
    %cst_133 = arith.constant 5.000000e-01 : f32
    %423 = vector.broadcast %cst_133 : f32 to vector<1x128xf32>
    %424 = arith.addf %422, %423 : vector<1x128xf32>
    %425 = vector.extract_strided_slice %416 {offsets = [0, 128], sizes = [1, 128], strides = [1, 1]} : vector<1x512xf32> to vector<1x128xf32>
    %cst_134 = arith.constant 5.000000e-01 : f32
    %426 = vector.broadcast %cst_134 : f32 to vector<1x128xf32>
    %427 = arith.mulf %426, %425 : vector<1x128xf32>
    %428 = math.tanh %427 : vector<1x128xf32>
    %cst_135 = arith.constant 5.000000e-01 : f32
    %429 = vector.broadcast %cst_135 : f32 to vector<1x128xf32>
    %430 = arith.mulf %429, %428 : vector<1x128xf32>
    %cst_136 = arith.constant 5.000000e-01 : f32
    %431 = vector.broadcast %cst_136 : f32 to vector<1x128xf32>
    %432 = arith.addf %430, %431 : vector<1x128xf32>
    %433 = vector.extract_strided_slice %416 {offsets = [0, 256], sizes = [1, 128], strides = [1, 1]} : vector<1x512xf32> to vector<1x128xf32>
    %434 = math.tanh %433 : vector<1x128xf32>
    %435 = vector.extract_strided_slice %416 {offsets = [0, 384], sizes = [1, 128], strides = [1, 1]} : vector<1x512xf32> to vector<1x128xf32>
    %cst_137 = arith.constant 5.000000e-01 : f32
    %436 = vector.broadcast %cst_137 : f32 to vector<1x128xf32>
    %437 = arith.mulf %436, %435 : vector<1x128xf32>
    %438 = math.tanh %437 : vector<1x128xf32>
    %cst_138 = arith.constant 5.000000e-01 : f32
    %439 = vector.broadcast %cst_138 : f32 to vector<1x128xf32>
    %440 = arith.mulf %439, %438 : vector<1x128xf32>
    %cst_139 = arith.constant 5.000000e-01 : f32
    %441 = vector.broadcast %cst_139 : f32 to vector<1x128xf32>
    %442 = arith.addf %440, %441 : vector<1x128xf32>
    %443 = arith.mulf %432, %373 : vector<1x128xf32>
    %444 = arith.mulf %424, %434 : vector<1x128xf32>
    %445 = arith.addf %443, %444 : vector<1x128xf32>
    %446 = math.tanh %445 : vector<1x128xf32>
    %447 = arith.mulf %442, %446 : vector<1x128xf32>
    %448 = vector.extract_strided_slice %11 {offsets = [6, 0], sizes = [1, 512], strides = [1, 1]} : vector<8x512xf32> to vector<1x512xf32>
    %449 = vector.extract_strided_slice %410 {offsets = [0, 0], sizes = [1, 16], strides = [1, 1]} : vector<1x128xf32> to vector<1x16xf32>
    %cst_140 = arith.constant dense<0.000000e+00> : vector<1x512xf32>
    %450 = tpu.matmul %449, %1, %cst_140 {dimension_numbers = #tpu.dot_dimension_numbers<[1], [0], [0], [1], [0, 0, 1, 1], [], []>} : vector<1x16xf32>, vector<16x512xf32>, vector<1x512xf32> -> vector<1x512xf32>
    %451 = arith.addf %448, %450 : vector<1x512xf32>
    %452 = vector.extract_strided_slice %451 {offsets = [0, 0], sizes = [1, 128], strides = [1, 1]} : vector<1x512xf32> to vector<1x128xf32>
    %cst_141 = arith.constant 5.000000e-01 : f32
    %453 = vector.broadcast %cst_141 : f32 to vector<1x128xf32>
    %454 = arith.mulf %453, %452 : vector<1x128xf32>
    %455 = math.tanh %454 : vector<1x128xf32>
    %cst_142 = arith.constant 5.000000e-01 : f32
    %456 = vector.broadcast %cst_142 : f32 to vector<1x128xf32>
    %457 = arith.mulf %456, %455 : vector<1x128xf32>
    %cst_143 = arith.constant 5.000000e-01 : f32
    %458 = vector.broadcast %cst_143 : f32 to vector<1x128xf32>
    %459 = arith.addf %457, %458 : vector<1x128xf32>
    %460 = vector.extract_strided_slice %451 {offsets = [0, 128], sizes = [1, 128], strides = [1, 1]} : vector<1x512xf32> to vector<1x128xf32>
    %cst_144 = arith.constant 5.000000e-01 : f32
    %461 = vector.broadcast %cst_144 : f32 to vector<1x128xf32>
    %462 = arith.mulf %461, %460 : vector<1x128xf32>
    %463 = math.tanh %462 : vector<1x128xf32>
    %cst_145 = arith.constant 5.000000e-01 : f32
    %464 = vector.broadcast %cst_145 : f32 to vector<1x128xf32>
    %465 = arith.mulf %464, %463 : vector<1x128xf32>
    %cst_146 = arith.constant 5.000000e-01 : f32
    %466 = vector.broadcast %cst_146 : f32 to vector<1x128xf32>
    %467 = arith.addf %465, %466 : vector<1x128xf32>
    %468 = vector.extract_strided_slice %451 {offsets = [0, 256], sizes = [1, 128], strides = [1, 1]} : vector<1x512xf32> to vector<1x128xf32>
    %469 = math.tanh %468 : vector<1x128xf32>
    %470 = vector.extract_strided_slice %451 {offsets = [0, 384], sizes = [1, 128], strides = [1, 1]} : vector<1x512xf32> to vector<1x128xf32>
    %cst_147 = arith.constant 5.000000e-01 : f32
    %471 = vector.broadcast %cst_147 : f32 to vector<1x128xf32>
    %472 = arith.mulf %471, %470 : vector<1x128xf32>
    %473 = math.tanh %472 : vector<1x128xf32>
    %cst_148 = arith.constant 5.000000e-01 : f32
    %474 = vector.broadcast %cst_148 : f32 to vector<1x128xf32>
    %475 = arith.mulf %474, %473 : vector<1x128xf32>
    %cst_149 = arith.constant 5.000000e-01 : f32
    %476 = vector.broadcast %cst_149 : f32 to vector<1x128xf32>
    %477 = arith.addf %475, %476 : vector<1x128xf32>
    %478 = arith.mulf %467, %408 : vector<1x128xf32>
    %479 = arith.mulf %459, %469 : vector<1x128xf32>
    %480 = arith.addf %478, %479 : vector<1x128xf32>
    %481 = math.tanh %480 : vector<1x128xf32>
    %482 = arith.mulf %477, %481 : vector<1x128xf32>
    %483 = vector.extract_strided_slice %482 {offsets = [0, 0], sizes = [1, 16], strides = [1, 1]} : vector<1x128xf32> to vector<1x16xf32>
    %cst_150 = arith.constant dense<0.000000e+00> : vector<1x512xf32>
    %484 = tpu.matmul %483, %3, %cst_150 {dimension_numbers = #tpu.dot_dimension_numbers<[1], [0], [0], [1], [0, 0, 1, 1], [], []>} : vector<1x16xf32>, vector<16x512xf32>, vector<1x512xf32> -> vector<1x512xf32>
    %485 = vector.extract_strided_slice %447 {offsets = [0, 0], sizes = [1, 32], strides = [1, 1]} : vector<1x128xf32> to vector<1x32xf32>
    %cst_151 = arith.constant dense<0.000000e+00> : vector<1x512xf32>
    %486 = tpu.matmul %485, %4, %cst_151 {dimension_numbers = #tpu.dot_dimension_numbers<[1], [0], [0], [1], [0, 0, 1, 1], [], []>} : vector<1x32xf32>, vector<32x512xf32>, vector<1x512xf32> -> vector<1x512xf32>
    %487 = arith.addf %484, %486 : vector<1x512xf32>
    %488 = arith.addf %487, %5 : vector<1x512xf32>
    %489 = vector.extract_strided_slice %488 {offsets = [0, 0], sizes = [1, 128], strides = [1, 1]} : vector<1x512xf32> to vector<1x128xf32>
    %cst_152 = arith.constant 5.000000e-01 : f32
    %490 = vector.broadcast %cst_152 : f32 to vector<1x128xf32>
    %491 = arith.mulf %490, %489 : vector<1x128xf32>
    %492 = math.tanh %491 : vector<1x128xf32>
    %cst_153 = arith.constant 5.000000e-01 : f32
    %493 = vector.broadcast %cst_153 : f32 to vector<1x128xf32>
    %494 = arith.mulf %493, %492 : vector<1x128xf32>
    %cst_154 = arith.constant 5.000000e-01 : f32
    %495 = vector.broadcast %cst_154 : f32 to vector<1x128xf32>
    %496 = arith.addf %494, %495 : vector<1x128xf32>
    %497 = vector.extract_strided_slice %488 {offsets = [0, 128], sizes = [1, 128], strides = [1, 1]} : vector<1x512xf32> to vector<1x128xf32>
    %cst_155 = arith.constant 5.000000e-01 : f32
    %498 = vector.broadcast %cst_155 : f32 to vector<1x128xf32>
    %499 = arith.mulf %498, %497 : vector<1x128xf32>
    %500 = math.tanh %499 : vector<1x128xf32>
    %cst_156 = arith.constant 5.000000e-01 : f32
    %501 = vector.broadcast %cst_156 : f32 to vector<1x128xf32>
    %502 = arith.mulf %501, %500 : vector<1x128xf32>
    %cst_157 = arith.constant 5.000000e-01 : f32
    %503 = vector.broadcast %cst_157 : f32 to vector<1x128xf32>
    %504 = arith.addf %502, %503 : vector<1x128xf32>
    %505 = vector.extract_strided_slice %488 {offsets = [0, 256], sizes = [1, 128], strides = [1, 1]} : vector<1x512xf32> to vector<1x128xf32>
    %506 = math.tanh %505 : vector<1x128xf32>
    %507 = vector.extract_strided_slice %488 {offsets = [0, 384], sizes = [1, 128], strides = [1, 1]} : vector<1x512xf32> to vector<1x128xf32>
    %cst_158 = arith.constant 5.000000e-01 : f32
    %508 = vector.broadcast %cst_158 : f32 to vector<1x128xf32>
    %509 = arith.mulf %508, %507 : vector<1x128xf32>
    %510 = math.tanh %509 : vector<1x128xf32>
    %cst_159 = arith.constant 5.000000e-01 : f32
    %511 = vector.broadcast %cst_159 : f32 to vector<1x128xf32>
    %512 = arith.mulf %511, %510 : vector<1x128xf32>
    %cst_160 = arith.constant 5.000000e-01 : f32
    %513 = vector.broadcast %cst_160 : f32 to vector<1x128xf32>
    %514 = arith.addf %512, %513 : vector<1x128xf32>
    %515 = arith.mulf %504, %445 : vector<1x128xf32>
    %516 = arith.mulf %496, %506 : vector<1x128xf32>
    %517 = arith.addf %515, %516 : vector<1x128xf32>
    %518 = math.tanh %517 : vector<1x128xf32>
    %519 = arith.mulf %514, %518 : vector<1x128xf32>
    %520 = vector.extract_strided_slice %11 {offsets = [7, 0], sizes = [1, 512], strides = [1, 1]} : vector<8x512xf32> to vector<1x512xf32>
    %521 = vector.extract_strided_slice %482 {offsets = [0, 0], sizes = [1, 16], strides = [1, 1]} : vector<1x128xf32> to vector<1x16xf32>
    %cst_161 = arith.constant dense<0.000000e+00> : vector<1x512xf32>
    %522 = tpu.matmul %521, %1, %cst_161 {dimension_numbers = #tpu.dot_dimension_numbers<[1], [0], [0], [1], [0, 0, 1, 1], [], []>} : vector<1x16xf32>, vector<16x512xf32>, vector<1x512xf32> -> vector<1x512xf32>
    %523 = arith.addf %520, %522 : vector<1x512xf32>
    %524 = vector.extract_strided_slice %523 {offsets = [0, 0], sizes = [1, 128], strides = [1, 1]} : vector<1x512xf32> to vector<1x128xf32>
    %cst_162 = arith.constant 5.000000e-01 : f32
    %525 = vector.broadcast %cst_162 : f32 to vector<1x128xf32>
    %526 = arith.mulf %525, %524 : vector<1x128xf32>
    %527 = math.tanh %526 : vector<1x128xf32>
    %cst_163 = arith.constant 5.000000e-01 : f32
    %528 = vector.broadcast %cst_163 : f32 to vector<1x128xf32>
    %529 = arith.mulf %528, %527 : vector<1x128xf32>
    %cst_164 = arith.constant 5.000000e-01 : f32
    %530 = vector.broadcast %cst_164 : f32 to vector<1x128xf32>
    %531 = arith.addf %529, %530 : vector<1x128xf32>
    %532 = vector.extract_strided_slice %523 {offsets = [0, 128], sizes = [1, 128], strides = [1, 1]} : vector<1x512xf32> to vector<1x128xf32>
    %cst_165 = arith.constant 5.000000e-01 : f32
    %533 = vector.broadcast %cst_165 : f32 to vector<1x128xf32>
    %534 = arith.mulf %533, %532 : vector<1x128xf32>
    %535 = math.tanh %534 : vector<1x128xf32>
    %cst_166 = arith.constant 5.000000e-01 : f32
    %536 = vector.broadcast %cst_166 : f32 to vector<1x128xf32>
    %537 = arith.mulf %536, %535 : vector<1x128xf32>
    %cst_167 = arith.constant 5.000000e-01 : f32
    %538 = vector.broadcast %cst_167 : f32 to vector<1x128xf32>
    %539 = arith.addf %537, %538 : vector<1x128xf32>
    %540 = vector.extract_strided_slice %523 {offsets = [0, 256], sizes = [1, 128], strides = [1, 1]} : vector<1x512xf32> to vector<1x128xf32>
    %541 = math.tanh %540 : vector<1x128xf32>
    %542 = vector.extract_strided_slice %523 {offsets = [0, 384], sizes = [1, 128], strides = [1, 1]} : vector<1x512xf32> to vector<1x128xf32>
    %cst_168 = arith.constant 5.000000e-01 : f32
    %543 = vector.broadcast %cst_168 : f32 to vector<1x128xf32>
    %544 = arith.mulf %543, %542 : vector<1x128xf32>
    %545 = math.tanh %544 : vector<1x128xf32>
    %cst_169 = arith.constant 5.000000e-01 : f32
    %546 = vector.broadcast %cst_169 : f32 to vector<1x128xf32>
    %547 = arith.mulf %546, %545 : vector<1x128xf32>
    %cst_170 = arith.constant 5.000000e-01 : f32
    %548 = vector.broadcast %cst_170 : f32 to vector<1x128xf32>
    %549 = arith.addf %547, %548 : vector<1x128xf32>
    %550 = arith.mulf %539, %480 : vector<1x128xf32>
    %551 = arith.mulf %531, %541 : vector<1x128xf32>
    %552 = arith.addf %550, %551 : vector<1x128xf32>
    %553 = math.tanh %552 : vector<1x128xf32>
    %554 = arith.mulf %549, %553 : vector<1x128xf32>
    %555 = vector.extract_strided_slice %554 {offsets = [0, 0], sizes = [1, 16], strides = [1, 1]} : vector<1x128xf32> to vector<1x16xf32>
    %cst_171 = arith.constant dense<0.000000e+00> : vector<1x512xf32>
    %556 = tpu.matmul %555, %3, %cst_171 {dimension_numbers = #tpu.dot_dimension_numbers<[1], [0], [0], [1], [0, 0, 1, 1], [], []>} : vector<1x16xf32>, vector<16x512xf32>, vector<1x512xf32> -> vector<1x512xf32>
    %557 = vector.extract_strided_slice %519 {offsets = [0, 0], sizes = [1, 32], strides = [1, 1]} : vector<1x128xf32> to vector<1x32xf32>
    %cst_172 = arith.constant dense<0.000000e+00> : vector<1x512xf32>
    %558 = tpu.matmul %557, %4, %cst_172 {dimension_numbers = #tpu.dot_dimension_numbers<[1], [0], [0], [1], [0, 0, 1, 1], [], []>} : vector<1x32xf32>, vector<32x512xf32>, vector<1x512xf32> -> vector<1x512xf32>
    %559 = arith.addf %556, %558 : vector<1x512xf32>
    %560 = arith.addf %559, %5 : vector<1x512xf32>
    %561 = vector.extract_strided_slice %560 {offsets = [0, 0], sizes = [1, 128], strides = [1, 1]} : vector<1x512xf32> to vector<1x128xf32>
    %cst_173 = arith.constant 5.000000e-01 : f32
    %562 = vector.broadcast %cst_173 : f32 to vector<1x128xf32>
    %563 = arith.mulf %562, %561 : vector<1x128xf32>
    %564 = math.tanh %563 : vector<1x128xf32>
    %cst_174 = arith.constant 5.000000e-01 : f32
    %565 = vector.broadcast %cst_174 : f32 to vector<1x128xf32>
    %566 = arith.mulf %565, %564 : vector<1x128xf32>
    %cst_175 = arith.constant 5.000000e-01 : f32
    %567 = vector.broadcast %cst_175 : f32 to vector<1x128xf32>
    %568 = arith.addf %566, %567 : vector<1x128xf32>
    %569 = vector.extract_strided_slice %560 {offsets = [0, 128], sizes = [1, 128], strides = [1, 1]} : vector<1x512xf32> to vector<1x128xf32>
    %cst_176 = arith.constant 5.000000e-01 : f32
    %570 = vector.broadcast %cst_176 : f32 to vector<1x128xf32>
    %571 = arith.mulf %570, %569 : vector<1x128xf32>
    %572 = math.tanh %571 : vector<1x128xf32>
    %cst_177 = arith.constant 5.000000e-01 : f32
    %573 = vector.broadcast %cst_177 : f32 to vector<1x128xf32>
    %574 = arith.mulf %573, %572 : vector<1x128xf32>
    %cst_178 = arith.constant 5.000000e-01 : f32
    %575 = vector.broadcast %cst_178 : f32 to vector<1x128xf32>
    %576 = arith.addf %574, %575 : vector<1x128xf32>
    %577 = vector.extract_strided_slice %560 {offsets = [0, 256], sizes = [1, 128], strides = [1, 1]} : vector<1x512xf32> to vector<1x128xf32>
    %578 = math.tanh %577 : vector<1x128xf32>
    %579 = vector.extract_strided_slice %560 {offsets = [0, 384], sizes = [1, 128], strides = [1, 1]} : vector<1x512xf32> to vector<1x128xf32>
    %cst_179 = arith.constant 5.000000e-01 : f32
    %580 = vector.broadcast %cst_179 : f32 to vector<1x128xf32>
    %581 = arith.mulf %580, %579 : vector<1x128xf32>
    %582 = math.tanh %581 : vector<1x128xf32>
    %cst_180 = arith.constant 5.000000e-01 : f32
    %583 = vector.broadcast %cst_180 : f32 to vector<1x128xf32>
    %584 = arith.mulf %583, %582 : vector<1x128xf32>
    %cst_181 = arith.constant 5.000000e-01 : f32
    %585 = vector.broadcast %cst_181 : f32 to vector<1x128xf32>
    %586 = arith.addf %584, %585 : vector<1x128xf32>
    %587 = arith.mulf %576, %517 : vector<1x128xf32>
    %588 = arith.mulf %568, %578 : vector<1x128xf32>
    %589 = arith.addf %587, %588 : vector<1x128xf32>
    %590 = math.tanh %589 : vector<1x128xf32>
    %591 = arith.mulf %586, %590 : vector<1x128xf32>
    %592 = vector.extract_strided_slice %591 {offsets = [0, 0], sizes = [1, 32], strides = [1, 1]} : vector<1x128xf32> to vector<1x32xf32>
    %cst_182 = arith.constant dense<0.000000e+00> : vector<1x128xf32>
    %593 = tpu.matmul %592, %6, %cst_182 {dimension_numbers = #tpu.dot_dimension_numbers<[1], [0], [0], [1], [0, 0, 1, 1], [], []>} : vector<1x32xf32>, vector<32x128xf32>, vector<1x128xf32> -> vector<1x128xf32>
    %594 = arith.addf %593, %7 : vector<1x128xf32>
    %c0_183 = arith.constant 0 : index
    %c0_184 = arith.constant 0 : index
    %595 = vector.load %arg2[%c0_183, %c0_184] : memref<1x128xf32, #tpu.memory_space<vmem>>, vector<1x128xf32>
    tpu.vector_store %arg2[%c0_183, %c0_184], %594 {strides = array<i32>} : memref<1x128xf32, #tpu.memory_space<vmem>>, vector<1x128xf32>,
    return
  }
}

</mosaic_0001>

<bundles_post_ra>
// kernel: lstm_forward.1
= control target key start
LH: loop header
LB: loop body
LE: loop exit
PB: predicated region body
PF: predicated region fallthrough
CT: control target
= control target key end

     0   :  { %7 = vsyncpa [#allocation3], 0  ;;  %s4809_s9 = smov [#allocation2]   ;;  %s5268_s0 = inlined_call_operand.vmem [shape: f32[8,8], index: 0, kind: input, shape index: {}]   ;;  %s5269_s1 = inlined_call_operand.hbm [shape: f32[128,512], index: 1, kind: input, shape index: {}]   ;;  %s5270_s2 = inlined_call_operand.vmem [shape: f32[1,128], index: 2, kind: output, shape index: {}]  }
   0x1   :  { %s15_s10 = sshll.u32 %s4809_s9, 4  ;;  %s4785_s13 = scalar_lea.hbm %s5269_s1, 8192  ;;  %s16_s10 = int_to_ptr.vmem [resolvable:$true] %s15_s10 }
   0x2   :  { %p4786_p0 = scmp.ne.s32.totalorder %s5269_s1, %s4785_s13  ;;  %p4789_p1 = scmp.lt.u32.totalorder %s4785_s13, %s5269_s1 }
   0x4   :  { %p4791_p2 = pnand %p4789_p1, %p4786_p0 }
   0x6   :  { %4794 = shalt.err (!%p4791_p2)
}
   0x7   :  { %s4795_s18 = scalar_lea.vmem %s16_s10, 8192  ;;  %p4800_p4 = scmp.lt.s32.totalorder %s16_s10, %s16_s10 }
   0x8   :  { %p4796_p3 = scmp.ne.s32.totalorder %s16_s10, %s4795_s18  ;;  %p4801_p5 = scmp.lt.s32.totalorder %s4795_s18, %s4795_s18 }
   0xa   :  { %p4802_p6 = por %p4801_p5, %p4800_p4 }
   0xc   :  { %p4803_p7 = pnand %p4802_p6, %p4796_p3 }
   0xe   :  { %4806 = shalt.err (!%p4803_p7)
}
   0xf   :  { %s4810_s19 = smov 512   ;;  %s4811_s20 = smov 32  }
  0x10   :  { %21 = dma.hbm_to_vmem [thread:$0]  %s5269_s1, 8192, %s16_s10, [#allocation3], %s4810_s19, %s4810_s19, %s4811_s20  }
  0x11   :  { %4807 = dma.done.wait [#allocation3], 8192  }
  0x12   :  { %4808 = vsyncadd [#allocation3], 4294959104  ;;  %v4812_v0 = vmov 0.0   ;;  %v28_v1 = vld [vmem:[#allocation2 + $0x18] sm:$0xff]  ;;  %v27_v2 = vld [vmem:[#allocation2 + $0x10] sm:$0xff]  ;;  %vm92_vm0 = vcmask 64512   ;;  %v72_v54 = vlaneseq }
  0x13   :  { %231 = vmatprep.mubr.f32.mxu1 %v4812_v0  ;;  %160 = vmatprep.mubr.f32.mxu0 %v4812_v0  ;;  %v26_v3 = vld [vmem:[#allocation2 + $0x8] sm:$0xff]  ;;  %v70_v4 = vld [vmem:[%s5268_s0] sm:$0xff]  ;;  %v32_v12 = vld [vmem:[#allocation2 + $0x38] sm:$0xff]  ;;  %vm238_vm1 = vcmask 130048   ;;  %vm406_vm2 = vcmask 261120   ;;  %vm4814_vm3 = vmmov 0  }
  0x14   :  { %167 = vmatprep.subr.mxu1 %v28_v1  ;;  %96 = vmatprep.subr.mxu0 %v26_v3  ;;  %v30_v5 = vld [vmem:[#allocation2 + $0x28] sm:$0xff]  ;;  %v25_v8 = vld [vmem:[#allocation2] sm:$0xff]  ;;  %v36_v13 = vld [vmem:[#allocation2 + $0x58] sm:$0xff]  ;;  %v4909_v55 = vshrl.u32 %v72_v54, 7 }
  0x15   :  { %v34_v6 = vld [vmem:[#allocation2 + $0x48] sm:$0xff]  ;;  %168 = vmatpush1.msra.mxu1 %v27_v2  ;;  %v29_v9 = vld [vmem:[#allocation2 + $0x20] sm:$0xff]  ;;  %97 = vmatpush1.msra.mxu0 %v25_v8  ;;  %v31_v14 = vld [vmem:[#allocation2 + $0x30] sm:$0xff]  ;;  %v4854_v15 = vpack.c.bf16 %v36_v13, %v32_v12 }
  0x16   :  { %v4847_v7 = vpack.c.bf16 %v34_v6, %v30_v5  ;;  %v33_v10 = vld [vmem:[#allocation2 + $0x40] sm:$0xff]  ;;  %4263 = vmatmul.mubr.msk.f32.vlgmr.msra.gmra.mrb[0].mxu1 %vm92_vm0, %v70_v4  ;;  %4262 = vmatmul.mubr.msk.f32.vlgmr.msra.gmra.mrb[0].mxu0 %vm92_vm0, %v70_v4  ;;  %v35_v16 = vld [vmem:[#allocation2 + $0x50] sm:$0xff]  ;;  %v48_v18 = vld [vmem:[#allocation2 + $0xc8] sm:$0xff]  ;;  %v74_v56 = vsub.s32 0, %v4909_v55  ;;  %v78_v57 = vsub.s32 1, %v4909_v55  ;;  %v82_v61 = vsub.s32 2, %v4909_v55 }
  0x17   :  { %v4850_v11 = vpack.c.bf16 %v33_v10, %v29_v9  ;;  %306 = vmatprep.mubr.f32.mxu1 %v4812_v0  ;;  %v4858_v17 = vpack.c.bf16 %v35_v16, %v31_v14  ;;  %473 = vmatprep.mubr.f32.mxu0 %v4812_v0  ;;  %v52_v19 = vld [vmem:[#allocation2 + $0xe8] sm:$0xff]  ;;  %v50_v20 = vld [vmem:[#allocation2 + $0xd8] sm:$0xff]  ;;  %v47_v23 = vld [vmem:[#allocation2 + $0xc0] sm:$0xff]  ;;  %v86_v6 = vsub.s32 3, %v4909_v55 }
  0x18   :  { %4326 = vmatprep.subr.bf16.mxu1 %v4847_v7  ;;  %v4867_v21 = vpack.c.bf16 %v52_v19, %v48_v18  ;;  %v54_v22 = vld [vmem:[#allocation2 + $0xf8] sm:$0xff]  ;;  %v51_v24 = vld [vmem:[#allocation2 + $0xe0] sm:$0xff]  ;;  %v49_v27 = vld [vmem:[#allocation2 + $0xd0] sm:$0xff] }
  0x19   :  { %4328 = vmatpush1.bf16.msra.mxu1 %v4850_v11  ;;  %v4869_v25 = vpack.c.bf16 %v54_v22, %v50_v20  ;;  %v4871_v26 = vpack.c.bf16 %v51_v24, %v47_v23  ;;  %v53_v28 = vld [vmem:[#allocation2 + $0xf0] sm:$0xff]  ;;  %v56_v30 = vld [vmem:[#allocation2 + $0x108] sm:$0xff]  ;;  %v58_v32 = vld [vmem:[#allocation2 + $0x118] sm:$0xff] }
  0x1a   :  { %4330 = vmatprep.subr.bf16.mxu1 %v4854_v15  ;;  %4334 = vmatprep.subr.bf16.mxu0 %v4867_v21  ;;  %v4874_v29 = vpack.c.bf16 %v53_v28, %v49_v27  ;;  %v60_v31 = vld [vmem:[#allocation2 + $0x128] sm:$0xff]  ;;  %v62_v34 = vld [vmem:[#allocation2 + $0x138] sm:$0xff]  ;;  %v55_v35 = vld [vmem:[#allocation2 + $0x100] sm:$0xff] }
  0x1b   :  { %4336 = vmatpush1.bf16.msra.mxu0 %v4871_v26  ;;  %v4879_v33 = vpack.c.bf16 %v60_v31, %v56_v30  ;;  %v59_v36 = vld [vmem:[#allocation2 + $0x120] sm:$0xff]  ;;  %v4881_v37 = vpack.c.bf16 %v62_v34, %v58_v32  ;;  %v57_v39 = vld [vmem:[#allocation2 + $0x110] sm:$0xff]  ;;  %v40_v42 = vld [vmem:[#allocation2 + $0x88] sm:$0xff] }
  0x1c   :  { %307 = vmatmul.mubr.f32.vlgmr.msra.gmra.mrb[2].mxu1 %v4812_v0  ;;  %v4883_v38 = vpack.c.bf16 %v59_v36, %v55_v35  ;;  %v61_v40 = vld [vmem:[#allocation2 + $0x130] sm:$0xff]  ;;  %v44_v43 = vld [vmem:[#allocation2 + $0xa8] sm:$0xff]  ;;  %v42_v44 = vld [vmem:[#allocation2 + $0x98] sm:$0xff] }
  0x1d   :  { %4332 = vmatpush1.bf16.msra.mxu1 %v4858_v17  ;;  %377 = vmatprep.mubr.f32.mxu1 %v4812_v0  ;;  %v4886_v41 = vpack.c.bf16 %v61_v40, %v57_v39  ;;  %v4894_v45 = vpack.c.bf16 %v44_v43, %v40_v42  ;;  %v39_v46 = vld [vmem:[#allocation2 + $0x80] sm:$0xff]  ;;  %v46_v48 = vld [vmem:[#allocation2 + $0xb8] sm:$0xff]  ;;  %v41_v51 = vld [vmem:[#allocation2 + $0x90] sm:$0xff] }
  0x1e   :  { %4342 = vmatprep.subr.bf16.mxu1 %v4869_v25  ;;  %4338 = vmatprep.subr.bf16.mxu0 %v4879_v33  ;;  %v43_v47 = vld [vmem:[#allocation2 + $0xa0] sm:$0xff]  ;;  %v4899_v50 = vpack.c.bf16 %v46_v48, %v42_v44  ;;  %v45_v52 = vld [vmem:[#allocation2 + $0xb0] sm:$0xff] }
  0x1f   :  { %4340 = vmatpush1.bf16.msra.mxu0 %v4883_v38  ;;  %v4897_v49 = vpack.c.bf16 %v43_v47, %v39_v46  ;;  %v4902_v53 = vpack.c.bf16 %v45_v52, %v41_v51  ;;  %v38_v58 = vld [vmem:[#allocation2 + $0x60] ss:$8 sm:$0xf] }
  0x20   :  { %378 = vmatmul.mubr.f32.vlgmr.msra.gmra.mrb[4].mxu1 %v4812_v0  ;;  %4350 = vmatprep.subr.bf16.mxu0 %v4894_v45  ;;  %v75_v59 = vrot.slane %v38_v58, %v74_v56  ;;  %v79_v60 = vrot.slane %v38_v58, %v78_v57  ;;  %v83_v5 = vrot.slane %v38_v58, %v82_v61  ;;  %v64_v51 = vld [vmem:[#allocation2 + $0x140] ss:$8 sm:$0xf] }
  0x21   :  { %544 = vmatprep.mubr.f32.mxu1 %v4812_v0  ;;  %4344 = vmatpush1.bf16.msra.mxu1 %v4874_v29  ;;  %v87_v14 = vrot.slane %v38_v58, %v86_v6  ;;  %v4960_v52 = vrot.slane %v64_v51, %v74_v56  ;;  %v4964_v54 = vrot.slane %v64_v51, %v78_v57 }
  0x22   :  { %4346 = vmatprep.subr.bf16.mxu1 %v4881_v37  ;;  %474 = vmatmul.mubr.f32.vlgmr.msra.gmra.mrb[2].mxu0 %v4812_v0  ;;  %v4974_v57 = vrot.slane %v64_v51, %v86_v6 }
  0x23   :  { %618 = vmatprep.mubr.f32.mxu0 %v4812_v0  ;;  %4352 = vmatpush1.bf16.msra.mxu0 %v4897_v49 }
  0x24   :  { %4358 = vmatprep.subr.bf16.mxu0 %v4847_v7 }
  0x25   :  { %4348 = vmatpush1.bf16.msra.mxu1 %v4886_v41 }
  0x26   :  { %4354 = vmatprep.subr.bf16.mxu1 %v4899_v50 }
  0x28   :  { %545 = vmatmul.mubr.f32.vlgmr.msra.gmra.mrb[6].mxu1 %v4812_v0 }
  0x29   :  { %689 = vmatprep.mubr.f32.mxu1 %v4812_v0  ;;  %4356 = vmatpush1.bf16.msra.mxu1 %v4902_v53 }
  0x2a   :  { %4362 = vmatprep.subr.bf16.mxu1 %v4854_v15 }
  0xe9   :  { %v233_v62 = vpop.f32.mrb[0].mxu1  ;;  %v162_v1 = vpop.f32.mrb[0].mxu0 }
  0xea   :  { %v235_v63 = vpop.f32.mrb[1].mxu1  ;;  %v4918_v2 = vadd.f32 %v162_v1, %v75_v59  ;;  %v164_v3 = vpop.f32.mrb[1].mxu0  ;;  %v4927_v13 = vadd.f32 %v233_v62, %v83_v5 }
  0xeb   :  { %v4920_v4 = vadd.f32 %v164_v3, %v79_v60  ;;  %v4932_v23 = vadd.f32 %v235_v63, %v87_v14  ;;  %v4968_v60 = vrot.slane %v64_v51, %v82_v61 }
  0xef   :  { %v308_v8 = vpop.f32.mrb[2].mxu1 }
  0xf0   :  { %v384_v9 = vadd.f32 %v308_v8, %v4918_v2  ;;  %v310_v10 = vpop.f32.mrb[3].mxu1 }
  0xf1   :  { %v385_v12 = vadd.f32 %v310_v10, %v4920_v4 }
  0xf2   :  { %v388_v16 = vmul.f32 0.5, %v384_v9 }
  0xf3   :  { %v392_v18 = vmul.f32 0.5, %v385_v12  ;;  %v379_v19 = vpop.f32.mrb[4].mxu1 }
  0xf4   :  { %4625 = vtanh.f32 %v388_v16  ;;  %v386_v20 = vadd.f32 %v379_v19, %v4927_v13  ;;  %v381_v22 = vpop.f32.mrb[5].mxu1 }
  0xf5   :  { %4627 = vtanh.f32 %v392_v18  ;;  %v387_v24 = vadd.f32 %v381_v22, %v4932_v23 }
  0xf6   :  { %4629 = vtanh.f32 %v386_v20 }
  0xf7   :  { %v397_v27 = vmul.f32 0.5, %v387_v24 }
  0xf9   :  { %4631 = vtanh.f32 %v397_v27 }
  0xfe   :  { %v4626_v28 = vpop.eup %4625 }
  0xff   :  { %v4628_v30 = vpop.eup %4627  ;;  %v390_v31 = vmul.f32 0.5, %v4626_v28 }
 0x100   :  { %v394_v32 = vmul.f32 0.5, %v4628_v30  ;;  %v4630_v35 = vpop.eup %4629 }
 0x101   :  { %v391_v34 = vadd.f32 0.5, %v390_v31 }
 0x102   :  { %v395_v36 = vadd.f32 0.5, %v394_v32 }
 0x103   :  { %v402_v39 = vmul.f32 %v4630_v35, %v391_v34  ;;  %v4632_v43 = vpop.eup %4631 }
 0x104   :  { %v401_v40 = vmul.f32 0.0, %v395_v36  ;;  %v399_v44 = vmul.f32 0.5, %v4632_v43 }
 0x106   :  { %v4935_v42 = vadd.f32 %v402_v39, %v401_v40  ;;  %v400_v46 = vadd.f32 0.5, %v399_v44 }
 0x108   :  { %4633 = vtanh.f32 %v4935_v42 }
 0x112   :  { %v4634_v47 = vpop.eup %4633 }
 0x113   :  { %v405_v48 = vmul.f32 %v4634_v47, %v400_v46 }
 0x115   :  { %4264 = vmatmul.mubr.msk.f32.vlgmr.msra.gmra.mrb[2].mxu0 %vm238_vm1, %v405_v48  ;;  %4265 = vmatmul.mubr.msk.f32.vlgmr.msra.gmra.mrb[6].mxu1 %vm238_vm1, %v405_v48 }
 0x116   :  { %4360 = vmatpush1.bf16.msra.mxu0 %v4850_v11  ;;  %4364 = vmatpush1.bf16.msra.mxu1 %v4858_v17 }
 0x117   :  { %803 = vmatprep.mubr.f32.mxu0 %v4812_v0  ;;  %874 = vmatprep.mubr.f32.mxu1 %v4812_v0 }
 0x118   :  { %4366 = vmatprep.subr.bf16.mxu0 %v4867_v21  ;;  %4374 = vmatprep.subr.bf16.mxu1 %v4869_v25 }
 0x119   :  { %4266 = vmatmul.mubr.msk.f32.vlgmr.msra.gmra.mrb[4].mxu0 %vm238_vm1, %v405_v48  ;;  %4267 = vmatmul.mubr.msk.f32.vlgmr.msra.gmra.mrb[8].mxu1 %vm238_vm1, %v405_v48 }
 0x11a   :  { %4368 = vmatpush1.bf16.msra.mxu0 %v4871_v26  ;;  %4376 = vmatpush1.bf16.msra.mxu1 %v4874_v29 }
 0x11b   :  { %4370 = vmatprep.subr.bf16.mxu0 %v4879_v33  ;;  %4378 = vmatprep.subr.bf16.mxu1 %v4881_v37 }
 0x11c   :  { %985 = vmatprep.mubr.f32.mxu0 %v4812_v0  ;;  %1056 = vmatprep.mubr.f32.mxu1 %v4812_v0 }
 0x11e   :  { %4372 = vmatpush1.bf16.msra.mxu0 %v4883_v38  ;;  %4380 = vmatpush1.bf16.msra.mxu1 %v4886_v41 }
 0x11f   :  { %4382 = vmatprep.subr.bf16.mxu0 %v4894_v45  ;;  %4386 = vmatprep.subr.bf16.mxu1 %v4899_v50 }
 0x1e8   :  { %v620_v58 = vpop.f32.mrb[2].mxu0  ;;  %v691_v59 = vpop.f32.mrb[6].mxu1 }
 0x1e9   :  { %v717_v62 = vadd.f32 %v4960_v52, %v620_v58  ;;  %v622_v63 = vpop.f32.mrb[3].mxu0  ;;  %v693_v1 = vpop.f32.mrb[7].mxu1  ;;  %v719_v10 = vadd.f32 %v4968_v60, %v691_v59 }
 0x1ea   :  { %v718_v3 = vadd.f32 %v4964_v54, %v622_v63  ;;  %v720_v22 = vadd.f32 %v4974_v57, %v693_v1 }
 0x1eb   :  { %v721_v5 = vmul.f32 0.5, %v717_v62 }
 0x1ec   :  { %v725_v8 = vmul.f32 0.5, %v718_v3  ;;  %v805_v56 = vpop.f32.mrb[4].mxu0  ;;  %v876_v9 = vpop.f32.mrb[8].mxu1  ;;  %v730_v28 = vmul.f32 0.5, %v720_v22  ;;  %v911_v3 = vrot.slane %v4935_v42, 7 }
 0x1ed   :  { %4635 = vtanh.f32 %v721_v5  ;;  %v885_v12 = vrot.slane %v805_v56, 7  ;;  %v807_v61 = vpop.f32.mrb[5].mxu0  ;;  %v878_v14 = vpop.f32.mrb[9].mxu1  ;;  %v887_v19 = vrot.slane %v876_v9, 7 }
 0x1ee   :  { %4637 = vtanh.f32 %v725_v8  ;;  %v886_v16 = vrot.slane %v807_v61, 7  ;;  %v888_v27 = vrot.slane %v878_v14, 7 }
 0x1ef   :  { %v893_v18 = vadd.f32 %v885_v12, %v4918_v2  ;;  %4639 = vtanh.f32 %v719_v10  ;;  %v895_v6 = vadd.f32 %v887_v19, %v4927_v13 }
 0x1f0   :  { %v894_v20 = vadd.f32 %v886_v16, %v4920_v4  ;;  %v896_v31 = vadd.f32 %v888_v27, %v4932_v23 }
 0x1f1   :  { %v897_v24 = vmul.f32 0.5, %v893_v18 }
 0x1f2   :  { %v901_v55 = vmul.f32 0.5, %v894_v20  ;;  %v906_v43 = vmul.f32 0.5, %v896_v31 }
 0x1f3   :  { %4641 = vtanh.f32 %v897_v24 }
 0x1f4   :  { %4643 = vtanh.f32 %v901_v55 }
 0x1f5   :  { %4645 = vtanh.f32 %v895_v6 }
 0x1f6   :  { %4647 = vtanh.f32 %v730_v28 }
 0x1f7   :  { %v4636_v30 = vpop.eup %4635  ;;  %4649 = vtanh.f32 %v906_v43 }
 0x1f8   :  { %v4638_v32 = vpop.eup %4637  ;;  %v723_v34 = vmul.f32 0.5, %v4636_v30 }
 0x1f9   :  { %v727_v35 = vmul.f32 0.5, %v4638_v32  ;;  %v4640_v39 = vpop.eup %4639 }
 0x1fa   :  { %v724_v36 = vadd.f32 0.5, %v723_v34 }
 0x1fb   :  { %v728_v40 = vadd.f32 0.5, %v727_v35 }
 0x1fc   :  { %v735_v44 = vmul.f32 %v4640_v39, %v724_v36 }
 0x1fd   :  { %v4642_v46 = vpop.eup %4641  ;;  %v734_v47 = vmul.f32 0.0, %v728_v40 }
 0x1fe   :  { %v4644_v48 = vpop.eup %4643  ;;  %v899_v51 = vmul.f32 0.5, %v4642_v46 }
 0x1ff   :  { %v4982_v58 = vadd.f32 %v735_v44, %v734_v47  ;;  %v903_v59 = vmul.f32 0.5, %v4644_v48  ;;  %v4646_v63 = vpop.eup %4645 }
 0x200   :  { %v900_v62 = vadd.f32 0.5, %v899_v51  ;;  %v4648_v8 = vpop.eup %4647 }
 0x201   :  { %4651 = vtanh.f32 %v4982_v58  ;;  %v904_v1 = vadd.f32 0.5, %v903_v59  ;;  %v732_v10 = vmul.f32 0.5, %v4648_v8  ;;  %v4650_v12 = vpop.eup %4649 }
 0x202   :  { %v914_v5 = vmul.f32 %v4646_v63, %v900_v62  ;;  %v908_v18 = vmul.f32 0.5, %v4650_v12 }
 0x203   :  { %v913_v56 = vmul.f32 %v911_v3, %v904_v1  ;;  %v733_v61 = vadd.f32 0.5, %v732_v10 }
 0x204   :  { %v909_v42 = vadd.f32 0.5, %v908_v18 }
 0x205   :  { %v4986_v9 = vadd.f32 %v914_v5, %v913_v56 }
 0x207   :  { %4653 = vtanh.f32 %v4986_v9 }
 0x20b   :  { %v4652_v14 = vpop.eup %4651 }
 0x20c   :  { %v738_v16 = vmul.f32 %v4652_v14, %v733_v61 }
 0x20e   :  { %4268 = vmatmul.mubr.msk.f32.vlgmr.msra.gmra.mrb[6].mxu0 %vm406_vm2, %v738_v16  ;;  %4269 = vmatmul.mubr.msk.f32.vlgmr.msra.gmra.mrb[10].mxu1 %vm406_vm2, %v738_v16 }
 0x20f   :  { %4384 = vmatpush1.bf16.msra.mxu0 %v4897_v49  ;;  %4388 = vmatpush1.bf16.msra.mxu1 %v4902_v53 }
 0x210   :  { %1131 = vmatprep.mubr.f32.mxu0 %v4812_v0  ;;  %1202 = vmatprep.mubr.f32.mxu1 %v4812_v0 }
 0x211   :  { %v4654_v19 = vpop.eup %4653  ;;  %4390 = vmatprep.subr.bf16.mxu0 %v4847_v7  ;;  %4394 = vmatprep.subr.bf16.mxu1 %v4854_v15 }
 0x212   :  { %v917_v20 = vmul.f32 %v4654_v19, %v909_v42 }
 0x214   :  { %v1064_v22 = vrot.slane %v917_v20, 1 }
 0x216   :  { %4270 = vmatmul.mubr.msk.f32.vlgmr.msra.gmra.mrb[6].mxu0 %vm238_vm1, %v1064_v22  ;;  %4271 = vmatmul.mubr.msk.f32.vlgmr.msra.gmra.mrb[10].mxu1 %vm238_vm1, %v1064_v22 }
 0x217   :  { %4392 = vmatpush1.bf16.msra.mxu0 %v4850_v11  ;;  %4396 = vmatpush1.bf16.msra.mxu1 %v4858_v17 }
 0x218   :  { %1295 = vmatprep.mubr.f32.mxu0 %v4812_v0  ;;  %1366 = vmatprep.mubr.f32.mxu1 %v4812_v0 }
 0x219   :  { %4398 = vmatprep.subr.bf16.mxu0 %v4867_v21  ;;  %4406 = vmatprep.subr.bf16.mxu1 %v4869_v25 }
 0x21a   :  { %4272 = vmatmul.mubr.msk.f32.vlgmr.msra.gmra.mrb[8].mxu0 %vm238_vm1, %v1064_v22  ;;  %4273 = vmatmul.mubr.msk.f32.vlgmr.msra.gmra.mrb[12].mxu1 %vm238_vm1, %v1064_v22 }
 0x21b   :  { %4400 = vmatpush1.bf16.msra.mxu0 %v4871_v26  ;;  %4408 = vmatpush1.bf16.msra.mxu1 %v4874_v29 }
 0x21c   :  { %4402 = vmatprep.subr.bf16.mxu0 %v4879_v33  ;;  %4410 = vmatprep.subr.bf16.mxu1 %v4881_v37 }
 0x21d   :  { %1477 = vmatprep.mubr.f32.mxu0 %v4812_v0  ;;  %1548 = vmatprep.mubr.f32.mxu1 %v4812_v0 }
 0x21f   :  { %4404 = vmatpush1.bf16.msra.mxu0 %v4883_v38  ;;  %4412 = vmatpush1.bf16.msra.mxu1 %v4886_v41 }
 0x220   :  { %4414 = vmatprep.subr.bf16.mxu0 %v4894_v45  ;;  %4418 = vmatprep.subr.bf16.mxu1 %v4899_v50 }
 0x2e9   :  { %v1133_v24 = vpop.f32.mrb[6].mxu0  ;;  %v1204_v55 = vpop.f32.mrb[10].mxu1 }
 0x2ea   :  { %v1209_v6 = vadd.f32 %v1133_v24, %v4960_v52  ;;  %v1135_v27 = vpop.f32.mrb[7].mxu0  ;;  %v1206_v28 = vpop.f32.mrb[11].mxu1  ;;  %v1211_v36 = vadd.f32 %v1204_v55, %v4968_v60 }
 0x2eb   :  { %v1210_v30 = vadd.f32 %v1135_v27, %v4964_v54  ;;  %v1212_v51 = vadd.f32 %v1206_v28, %v4974_v57 }
 0x2ec   :  { %v1213_v31 = vmul.f32 0.5, %v1209_v6 }
 0x2ed   :  { %v1217_v32 = vmul.f32 0.5, %v1210_v30  ;;  %v1297_v34 = vpop.f32.mrb[8].mxu0  ;;  %v1368_v35 = vpop.f32.mrb[12].mxu1  ;;  %v1222_v3 = vmul.f32 0.5, %v1212_v51 }
 0x2ee   :  { %4655 = vtanh.f32 %v1213_v31  ;;  %v1377_v39 = vrot.slane %v1297_v34, 6  ;;  %v1299_v40 = vpop.f32.mrb[9].mxu0  ;;  %v1370_v43 = vpop.f32.mrb[13].mxu1  ;;  %v1379_v47 = vrot.slane %v1368_v35, 6  ;;  %v1403_v31 = vrot.slane %v4986_v9, 7 }
 0x2ef   :  { %4657 = vtanh.f32 %v1217_v32  ;;  %v1378_v44 = vrot.slane %v1299_v40, 6  ;;  %v1380_v1 = vrot.slane %v1370_v43, 6 }
 0x2f0   :  { %v1385_v46 = vadd.f32 %v1377_v39, %v4918_v2  ;;  %4659 = vtanh.f32 %v1211_v36  ;;  %v1387_v63 = vadd.f32 %v1379_v47, %v4927_v13 }
 0x2f1   :  { %v1386_v48 = vadd.f32 %v1378_v44, %v4920_v4  ;;  %v1388_v8 = vadd.f32 %v1380_v1, %v4932_v23 }
 0x2f2   :  { %v1389_v59 = vmul.f32 0.5, %v1385_v46 }
 0x2f3   :  { %v1393_v62 = vmul.f32 0.5, %v1386_v48  ;;  %v1398_v18 = vmul.f32 0.5, %v1388_v8 }
 0x2f4   :  { %4661 = vtanh.f32 %v1389_v59 }
 0x2f5   :  { %4663 = vtanh.f32 %v1393_v62 }
 0x2f6   :  { %4665 = vtanh.f32 %v1387_v63 }
 0x2f7   :  { %4667 = vtanh.f32 %v1222_v3 }
 0x2f8   :  { %v4656_v5 = vpop.eup %4655  ;;  %4669 = vtanh.f32 %v1398_v18 }
 0x2f9   :  { %v4658_v56 = vpop.eup %4657  ;;  %v1215_v10 = vmul.f32 0.5, %v4656_v5 }
 0x2fa   :  { %v1219_v12 = vmul.f32 0.5, %v4658_v56  ;;  %v4660_v14 = vpop.eup %4659 }
 0x2fb   :  { %v1216_v61 = vadd.f32 0.5, %v1215_v10 }
 0x2fc   :  { %v1220_v16 = vadd.f32 0.5, %v1219_v12 }
 0x2fd   :  { %v1227_v42 = vmul.f32 %v4660_v14, %v1216_v61 }
 0x2fe   :  { %v4662_v19 = vpop.eup %4661  ;;  %v1226_v20 = vmul.f32 %v1220_v16, %v4982_v58 }
 0x2ff   :  { %v4664_v22 = vpop.eup %4663  ;;  %v1391_v24 = vmul.f32 0.5, %v4662_v19 }
 0x300   :  { %v5026_v55 = vadd.f32 %v1227_v42, %v1226_v20  ;;  %v1395_v6 = vmul.f32 0.5, %v4664_v22  ;;  %v4666_v28 = vpop.eup %4665 }
 0x301   :  { %v1392_v27 = vadd.f32 0.5, %v1391_v24  ;;  %v4668_v34 = vpop.eup %4667 }
 0x302   :  { %4671 = vtanh.f32 %v5026_v55  ;;  %v1396_v30 = vadd.f32 0.5, %v1395_v6  ;;  %v1224_v39 = vmul.f32 0.5, %v4668_v34  ;;  %v4670_v58 = vpop.eup %4669 }
 0x303   :  { %v1406_v32 = vmul.f32 %v4666_v28, %v1392_v27  ;;  %v1400_v46 = vmul.f32 0.5, %v4670_v58 }
 0x304   :  { %v1405_v35 = vmul.f32 %v1403_v31, %v1396_v30  ;;  %v1225_v40 = vadd.f32 0.5, %v1224_v39 }
 0x305   :  { %v1401_v9 = vadd.f32 0.5, %v1400_v46 }
 0x306   :  { %v5030_v36 = vadd.f32 %v1406_v32, %v1405_v35 }
 0x308   :  { %4673 = vtanh.f32 %v5030_v36 }
 0x30c   :  { %v4672_v43 = vpop.eup %4671 }
 0x30d   :  { %v1230_v44 = vmul.f32 %v4672_v43, %v1225_v40 }
 0x30f   :  { %4274 = vmatmul.mubr.msk.f32.vlgmr.msra.gmra.mrb[10].mxu0 %vm406_vm2, %v1230_v44  ;;  %4275 = vmatmul.mubr.msk.f32.vlgmr.msra.gmra.mrb[14].mxu1 %vm406_vm2, %v1230_v44 }
 0x310   :  { %4416 = vmatpush1.bf16.msra.mxu0 %v4897_v49  ;;  %4420 = vmatpush1.bf16.msra.mxu1 %v4902_v53 }
 0x311   :  { %1623 = vmatprep.mubr.f32.mxu0 %v4812_v0  ;;  %1694 = vmatprep.mubr.f32.mxu1 %v4812_v0 }
 0x312   :  { %v4674_v47 = vpop.eup %4673  ;;  %4422 = vmatprep.subr.bf16.mxu0 %v4847_v7  ;;  %4426 = vmatprep.subr.bf16.mxu1 %v4854_v15 }
 0x313   :  { %v1409_v48 = vmul.f32 %v4674_v47, %v1401_v9 }
 0x315   :  { %v1556_v51 = vrot.slane %v1409_v48, 2 }
 0x317   :  { %4276 = vmatmul.mubr.msk.f32.vlgmr.msra.gmra.mrb[10].mxu0 %vm238_vm1, %v1556_v51  ;;  %4277 = vmatmul.mubr.msk.f32.vlgmr.msra.gmra.mrb[14].mxu1 %vm238_vm1, %v1556_v51 }
 0x318   :  { %4424 = vmatpush1.bf16.msra.mxu0 %v4850_v11  ;;  %4428 = vmatpush1.bf16.msra.mxu1 %v4858_v17 }
 0x319   :  { %1787 = vmatprep.mubr.f32.mxu0 %v4812_v0  ;;  %1858 = vmatprep.mubr.f32.mxu1 %v4812_v0 }
 0x31a   :  { %4430 = vmatprep.subr.bf16.mxu0 %v4867_v21  ;;  %4438 = vmatprep.subr.bf16.mxu1 %v4869_v25 }
 0x31b   :  { %4278 = vmatmul.mubr.msk.f32.vlgmr.msra.gmra.mrb[12].mxu0 %vm238_vm1, %v1556_v51  ;;  %4279 = vmatmul.mubr.msk.f32.vlgmr.msra.gmra.mrb[16].mxu1 %vm238_vm1, %v1556_v51 }
 0x31c   :  { %4432 = vmatpush1.bf16.msra.mxu0 %v4871_v26  ;;  %4440 = vmatpush1.bf16.msra.mxu1 %v4874_v29 }
 0x31d   :  { %4434 = vmatprep.subr.bf16.mxu0 %v4879_v33  ;;  %4442 = vmatprep.subr.bf16.mxu1 %v4881_v37 }
 0x31e   :  { %1969 = vmatprep.mubr.f32.mxu0 %v4812_v0  ;;  %2040 = vmatprep.mubr.f32.mxu1 %v4812_v0 }
 0x320   :  { %4436 = vmatpush1.bf16.msra.mxu0 %v4883_v38  ;;  %4444 = vmatpush1.bf16.msra.mxu1 %v4886_v41 }
 0x321   :  { %4446 = vmatprep.subr.bf16.mxu0 %v4894_v45  ;;  %4450 = vmatprep.subr.bf16.mxu1 %v4899_v50 }
 0x3ea   :  { %v1625_v59 = vpop.f32.mrb[10].mxu0  ;;  %v1696_v62 = vpop.f32.mrb[14].mxu1 }
 0x3eb   :  { %v1701_v63 = vadd.f32 %v1625_v59, %v4960_v52  ;;  %v1627_v1 = vpop.f32.mrb[11].mxu0  ;;  %v1698_v3 = vpop.f32.mrb[15].mxu1  ;;  %v1703_v61 = vadd.f32 %v1696_v62, %v4968_v60 }
 0x3ec   :  { %v1702_v5 = vadd.f32 %v1627_v1, %v4964_v54  ;;  %v1704_v24 = vadd.f32 %v1698_v3, %v4974_v57 }
 0x3ed   :  { %v1705_v8 = vmul.f32 0.5, %v1701_v63 }
 0x3ee   :  { %v1709_v56 = vmul.f32 0.5, %v1702_v5  ;;  %v1789_v10 = vpop.f32.mrb[12].mxu0  ;;  %v1860_v12 = vpop.f32.mrb[16].mxu1  ;;  %v1714_v31 = vmul.f32 0.5, %v1704_v24 }
 0x3ef   :  { %4675 = vtanh.f32 %v1705_v8  ;;  %v1869_v14 = vrot.slane %v1789_v10, 5  ;;  %v1791_v16 = vpop.f32.mrb[13].mxu0  ;;  %v1862_v18 = vpop.f32.mrb[17].mxu1  ;;  %v1871_v20 = vrot.slane %v1860_v12, 5  ;;  %v1895_v8 = vrot.slane %v5030_v36, 7 }
 0x3f0   :  { %4677 = vtanh.f32 %v1709_v56  ;;  %v1870_v42 = vrot.slane %v1791_v16, 5  ;;  %v1872_v30 = vrot.slane %v1862_v18, 5 }
 0x3f1   :  { %v1877_v19 = vadd.f32 %v1869_v14, %v4918_v2  ;;  %4679 = vtanh.f32 %v1703_v61  ;;  %v1879_v28 = vadd.f32 %v1871_v20, %v4927_v13 }
 0x3f2   :  { %v1878_v22 = vadd.f32 %v1870_v42, %v4920_v4  ;;  %v1880_v34 = vadd.f32 %v1872_v30, %v4932_v23 }
 0x3f3   :  { %v1881_v6 = vmul.f32 0.5, %v1877_v19 }
 0x3f4   :  { %v1885_v27 = vmul.f32 0.5, %v1878_v22  ;;  %v1890_v46 = vmul.f32 0.5, %v1880_v34 }
 0x3f5   :  { %4681 = vtanh.f32 %v1881_v6 }
 0x3f6   :  { %4683 = vtanh.f32 %v1885_v27 }
 0x3f7   :  { %4685 = vtanh.f32 %v1879_v28 }
 0x3f8   :  { %4687 = vtanh.f32 %v1714_v31 }
 0x3f9   :  { %v4676_v32 = vpop.eup %4675  ;;  %4689 = vtanh.f32 %v1890_v46 }
 0x3fa   :  { %v4678_v35 = vpop.eup %4677  ;;  %v1707_v39 = vmul.f32 0.5, %v4676_v32 }
 0x3fb   :  { %v1711_v58 = vmul.f32 0.5, %v4678_v35  ;;  %v4680_v43 = vpop.eup %4679 }
 0x3fc   :  { %v1708_v40 = vadd.f32 0.5, %v1707_v39 }
 0x3fd   :  { %v1712_v44 = vadd.f32 0.5, %v1711_v58 }
 0x3fe   :  { %v1719_v9 = vmul.f32 %v4680_v43, %v1708_v40 }
 0x3ff   :  { %v4682_v47 = vpop.eup %4681  ;;  %v1718_v48 = vmul.f32 %v1712_v44, %v5026_v55 }
 0x400   :  { %v4684_v51 = vpop.eup %4683  ;;  %v1883_v59 = vmul.f32 0.5, %v4682_v47 }
 0x401   :  { %v5070_v62 = vadd.f32 %v1719_v9, %v1718_v48  ;;  %v1887_v63 = vmul.f32 0.5, %v4684_v51  ;;  %v4686_v3 = vpop.eup %4685 }
 0x402   :  { %v1884_v1 = vadd.f32 0.5, %v1883_v59  ;;  %v4688_v10 = vpop.eup %4687 }
 0x403   :  { %4691 = vtanh.f32 %v5070_v62  ;;  %v1888_v5 = vadd.f32 0.5, %v1887_v63  ;;  %v1716_v14 = vmul.f32 0.5, %v4688_v10  ;;  %v4690_v55 = vpop.eup %4689 }
 0x404   :  { %v1898_v56 = vmul.f32 %v4686_v3, %v1884_v1  ;;  %v1892_v19 = vmul.f32 0.5, %v4690_v55 }
 0x405   :  { %v1897_v12 = vmul.f32 %v1895_v8, %v1888_v5  ;;  %v1717_v16 = vadd.f32 0.5, %v1716_v14 }
 0x406   :  { %v1893_v36 = vadd.f32 0.5, %v1892_v19 }
 0x407   :  { %v5074_v61 = vadd.f32 %v1898_v56, %v1897_v12 }
 0x409   :  { %4693 = vtanh.f32 %v5074_v61 }
 0x40d   :  { %v4692_v18 = vpop.eup %4691 }
 0x40e   :  { %v1722_v42 = vmul.f32 %v4692_v18, %v1717_v16 }
 0x410   :  { %4280 = vmatmul.mubr.msk.f32.vlgmr.msra.gmra.mrb[14].mxu0 %vm406_vm2, %v1722_v42  ;;  %4281 = vmatmul.mubr.msk.f32.vlgmr.msra.gmra.mrb[18].mxu1 %vm406_vm2, %v1722_v42 }
 0x411   :  { %4448 = vmatpush1.bf16.msra.mxu0 %v4897_v49  ;;  %4452 = vmatpush1.bf16.msra.mxu1 %v4902_v53 }
 0x412   :  { %2115 = vmatprep.mubr.f32.mxu0 %v4812_v0  ;;  %2186 = vmatprep.mubr.f32.mxu1 %v4812_v0 }
 0x413   :  { %v4694_v20 = vpop.eup %4693  ;;  %4454 = vmatprep.subr.bf16.mxu0 %v4847_v7  ;;  %4458 = vmatprep.subr.bf16.mxu1 %v4854_v15 }
 0x414   :  { %v1901_v22 = vmul.f32 %v4694_v20, %v1893_v36 }
 0x416   :  { %v2048_v24 = vrot.slane %v1901_v22, 3 }
 0x418   :  { %4282 = vmatmul.mubr.msk.f32.vlgmr.msra.gmra.mrb[14].mxu0 %vm238_vm1, %v2048_v24  ;;  %4283 = vmatmul.mubr.msk.f32.vlgmr.msra.gmra.mrb[18].mxu1 %vm238_vm1, %v2048_v24 }
 0x419   :  { %4456 = vmatpush1.bf16.msra.mxu0 %v4850_v11  ;;  %4460 = vmatpush1.bf16.msra.mxu1 %v4858_v17 }
 0x41a   :  { %2279 = vmatprep.mubr.f32.mxu0 %v4812_v0  ;;  %2350 = vmatprep.mubr.f32.mxu1 %v4812_v0 }
 0x41b   :  { %4462 = vmatprep.subr.bf16.mxu0 %v4867_v21  ;;  %4470 = vmatprep.subr.bf16.mxu1 %v4869_v25 }
 0x41c   :  { %4284 = vmatmul.mubr.msk.f32.vlgmr.msra.gmra.mrb[16].mxu0 %vm238_vm1, %v2048_v24  ;;  %4285 = vmatmul.mubr.msk.f32.vlgmr.msra.gmra.mrb[20].mxu1 %vm238_vm1, %v2048_v24 }
 0x41d   :  { %4464 = vmatpush1.bf16.msra.mxu0 %v4871_v26  ;;  %4472 = vmatpush1.bf16.msra.mxu1 %v4874_v29 }
 0x41e   :  { %4466 = vmatprep.subr.bf16.mxu0 %v4879_v33  ;;  %4474 = vmatprep.subr.bf16.mxu1 %v4881_v37 }
 0x41f   :  { %2461 = vmatprep.mubr.f32.mxu0 %v4812_v0  ;;  %2532 = vmatprep.mubr.f32.mxu1 %v4812_v0 }
 0x421   :  { %4468 = vmatpush1.bf16.msra.mxu0 %v4883_v38  ;;  %4476 = vmatpush1.bf16.msra.mxu1 %v4886_v41 }
 0x422   :  { %4478 = vmatprep.subr.bf16.mxu0 %v4894_v45  ;;  %4482 = vmatprep.subr.bf16.mxu1 %v4899_v50 }
 0x4eb   :  { %v2117_v6 = vpop.f32.mrb[14].mxu0  ;;  %v2188_v27 = vpop.f32.mrb[18].mxu1 }
 0x4ec   :  { %v2193_v28 = vadd.f32 %v2117_v6, %v4960_v52  ;;  %v2119_v30 = vpop.f32.mrb[15].mxu0  ;;  %v2190_v31 = vpop.f32.mrb[19].mxu1  ;;  %v2195_v40 = vadd.f32 %v2188_v27, %v4968_v60 }
 0x4ed   :  { %v2194_v32 = vadd.f32 %v2119_v30, %v4964_v54  ;;  %v2196_v59 = vadd.f32 %v2190_v31, %v4974_v57 }
 0x4ee   :  { %v2197_v34 = vmul.f32 0.5, %v2193_v28 }
 0x4ef   :  { %v2201_v35 = vmul.f32 0.5, %v2194_v32  ;;  %v2281_v39 = vpop.f32.mrb[16].mxu0  ;;  %v2352_v58 = vpop.f32.mrb[20].mxu1  ;;  %v2206_v8 = vmul.f32 0.5, %v2196_v59 }
 0x4f0   :  { %4695 = vtanh.f32 %v2197_v34  ;;  %v2361_v43 = vrot.slane %v2281_v39, 4  ;;  %v2283_v44 = vpop.f32.mrb[17].mxu0  ;;  %v2354_v46 = vpop.f32.mrb[21].mxu1  ;;  %v2363_v48 = vrot.slane %v2352_v58, 4  ;;  %v2387_v34 = vrot.slane %v5074_v61, 7 }
 0x4f1   :  { %4697 = vtanh.f32 %v2201_v35  ;;  %v2362_v9 = vrot.slane %v2283_v44, 4  ;;  %v2364_v5 = vrot.slane %v2354_v46, 4 }
 0x4f2   :  { %v2369_v47 = vadd.f32 %v2361_v43, %v4918_v2  ;;  %4699 = vtanh.f32 %v2195_v40  ;;  %v2371_v3 = vadd.f32 %v2363_v48, %v4927_v13 }
 0x4f3   :  { %v2370_v51 = vadd.f32 %v2362_v9, %v4920_v4  ;;  %v2372_v10 = vadd.f32 %v2364_v5, %v4932_v23 }
 0x4f4   :  { %v2373_v63 = vmul.f32 0.5, %v2369_v47 }
 0x4f5   :  { %v2377_v1 = vmul.f32 0.5, %v2370_v51  ;;  %v2382_v19 = vmul.f32 0.5, %v2372_v10 }
 0x4f6   :  { %4701 = vtanh.f32 %v2373_v63 }
 0x4f7   :  { %4703 = vtanh.f32 %v2377_v1 }
 0x4f8   :  { %4705 = vtanh.f32 %v2371_v3 }
 0x4f9   :  { %4707 = vtanh.f32 %v2206_v8 }
 0x4fa   :  { %v4696_v56 = vpop.eup %4695  ;;  %4709 = vtanh.f32 %v2382_v19 }
 0x4fb   :  { %v4698_v12 = vpop.eup %4697  ;;  %v2199_v14 = vmul.f32 0.5, %v4696_v56 }
 0x4fc   :  { %v2203_v55 = vmul.f32 0.5, %v4698_v12  ;;  %v4700_v18 = vpop.eup %4699 }
 0x4fd   :  { %v2200_v16 = vadd.f32 0.5, %v2199_v14 }
 0x4fe   :  { %v2204_v42 = vadd.f32 0.5, %v2203_v55 }
 0x4ff   :  { %v2211_v36 = vmul.f32 %v4700_v18, %v2200_v16 }
 0x500   :  { %v4702_v20 = vpop.eup %4701  ;;  %v2210_v22 = vmul.f32 %v2204_v42, %v5070_v62 }
 0x501   :  { %v4704_v24 = vpop.eup %4703  ;;  %v2375_v6 = vmul.f32 0.5, %v4702_v20 }
 0x502   :  { %v5114_v27 = vadd.f32 %v2211_v36, %v2210_v22  ;;  %v2379_v28 = vmul.f32 0.5, %v4704_v24  ;;  %v4706_v31 = vpop.eup %4705 }
 0x503   :  { %v2376_v30 = vadd.f32 0.5, %v2375_v6  ;;  %v4708_v39 = vpop.eup %4707 }
 0x504   :  { %4711 = vtanh.f32 %v5114_v27  ;;  %v2380_v32 = vadd.f32 0.5, %v2379_v28  ;;  %v2208_v43 = vmul.f32 0.5, %v4708_v39  ;;  %v4710_v62 = vpop.eup %4709 }
 0x505   :  { %v2390_v35 = vmul.f32 %v4706_v31, %v2376_v30  ;;  %v2384_v47 = vmul.f32 0.5, %v4710_v62 }
 0x506   :  { %v2389_v58 = vmul.f32 %v2387_v34, %v2380_v32  ;;  %v2209_v44 = vadd.f32 0.5, %v2208_v43 }
 0x507   :  { %v2385_v61 = vadd.f32 0.5, %v2384_v47 }
 0x508   :  { %v5118_v40 = vadd.f32 %v2390_v35, %v2389_v58 }
 0x50a   :  { %4713 = vtanh.f32 %v5118_v40 }
 0x50e   :  { %v4712_v46 = vpop.eup %4711 }
 0x50f   :  { %v2214_v9 = vmul.f32 %v4712_v46, %v2209_v44 }
 0x511   :  { %4286 = vmatmul.mubr.msk.f32.vlgmr.msra.gmra.mrb[18].mxu0 %vm406_vm2, %v2214_v9  ;;  %4287 = vmatmul.mubr.msk.f32.vlgmr.msra.gmra.mrb[22].mxu1 %vm406_vm2, %v2214_v9 }
 0x512   :  { %4480 = vmatpush1.bf16.msra.mxu0 %v4897_v49  ;;  %4484 = vmatpush1.bf16.msra.mxu1 %v4902_v53 }
 0x513   :  { %2607 = vmatprep.mubr.f32.mxu0 %v4812_v0  ;;  %2678 = vmatprep.mubr.f32.mxu1 %v4812_v0 }
 0x514   :  { %v4714_v48 = vpop.eup %4713  ;;  %4486 = vmatprep.subr.bf16.mxu0 %v4847_v7  ;;  %4490 = vmatprep.subr.bf16.mxu1 %v4854_v15 }
 0x515   :  { %v2393_v51 = vmul.f32 %v4714_v48, %v2385_v61 }
 0x517   :  { %v2540_v59 = vrot.slane %v2393_v51, 4 }
 0x519   :  { %4288 = vmatmul.mubr.msk.f32.vlgmr.msra.gmra.mrb[18].mxu0 %vm238_vm1, %v2540_v59  ;;  %4289 = vmatmul.mubr.msk.f32.vlgmr.msra.gmra.mrb[22].mxu1 %vm238_vm1, %v2540_v59 }
 0x51a   :  { %4488 = vmatpush1.bf16.msra.mxu0 %v4850_v11  ;;  %4492 = vmatpush1.bf16.msra.mxu1 %v4858_v17 }
 0x51b   :  { %2771 = vmatprep.mubr.f32.mxu0 %v4812_v0  ;;  %2842 = vmatprep.mubr.f32.mxu1 %v4812_v0 }
 0x51c   :  { %4494 = vmatprep.subr.bf16.mxu0 %v4867_v21  ;;  %4502 = vmatprep.subr.bf16.mxu1 %v4869_v25 }
 0x51d   :  { %4290 = vmatmul.mubr.msk.f32.vlgmr.msra.gmra.mrb[20].mxu0 %vm238_vm1, %v2540_v59  ;;  %4291 = vmatmul.mubr.msk.f32.vlgmr.msra.gmra.mrb[24].mxu1 %vm238_vm1, %v2540_v59 }
 0x51e   :  { %4496 = vmatpush1.bf16.msra.mxu0 %v4871_v26  ;;  %4504 = vmatpush1.bf16.msra.mxu1 %v4874_v29 }
 0x51f   :  { %4498 = vmatprep.subr.bf16.mxu0 %v4879_v33  ;;  %4506 = vmatprep.subr.bf16.mxu1 %v4881_v37 }
 0x520   :  { %2953 = vmatprep.mubr.f32.mxu0 %v4812_v0  ;;  %3024 = vmatprep.mubr.f32.mxu1 %v4812_v0 }
 0x522   :  { %4500 = vmatpush1.bf16.msra.mxu0 %v4883_v38  ;;  %4508 = vmatpush1.bf16.msra.mxu1 %v4886_v41 }
 0x523   :  { %4510 = vmatprep.subr.bf16.mxu0 %v4894_v45  ;;  %4514 = vmatprep.subr.bf16.mxu1 %v4899_v50 }
 0x5ec   :  { %v2609_v63 = vpop.f32.mrb[18].mxu0  ;;  %v2680_v1 = vpop.f32.mrb[22].mxu1 }
 0x5ed   :  { %v2685_v3 = vadd.f32 %v2609_v63, %v4960_v52  ;;  %v2611_v5 = vpop.f32.mrb[19].mxu0  ;;  %v2682_v8 = vpop.f32.mrb[23].mxu1  ;;  %v2687_v16 = vadd.f32 %v2680_v1, %v4968_v60 }
 0x5ee   :  { %v2686_v56 = vadd.f32 %v2611_v5, %v4964_v54  ;;  %v2688_v6 = vadd.f32 %v2682_v8, %v4974_v57 }
 0x5ef   :  { %v2689_v10 = vmul.f32 0.5, %v2685_v3 }
 0x5f0   :  { %v2693_v12 = vmul.f32 0.5, %v2686_v56  ;;  %v2773_v14 = vpop.f32.mrb[20].mxu0  ;;  %v2844_v55 = vpop.f32.mrb[24].mxu1  ;;  %v2698_v34 = vmul.f32 0.5, %v2688_v6 }
 0x5f1   :  { %4715 = vtanh.f32 %v2689_v10  ;;  %v2853_v18 = vrot.slane %v2773_v14, 3  ;;  %v2775_v42 = vpop.f32.mrb[21].mxu0  ;;  %v2846_v19 = vpop.f32.mrb[25].mxu1  ;;  %v2855_v22 = vrot.slane %v2844_v55, 3  ;;  %v2879_v10 = vrot.slane %v5118_v40, 7 }
 0x5f2   :  { %4717 = vtanh.f32 %v2693_v12  ;;  %v2854_v36 = vrot.slane %v2775_v42, 3  ;;  %v2856_v32 = vrot.slane %v2846_v19, 3 }
 0x5f3   :  { %v2861_v20 = vadd.f32 %v2853_v18, %v4918_v2  ;;  %4719 = vtanh.f32 %v2687_v16  ;;  %v2863_v31 = vadd.f32 %v2855_v22, %v4927_v13 }
 0x5f4   :  { %v2862_v24 = vadd.f32 %v2854_v36, %v4920_v4  ;;  %v2864_v39 = vadd.f32 %v2856_v32, %v4932_v23 }
 0x5f5   :  { %v2865_v28 = vmul.f32 0.5, %v2861_v20 }
 0x5f6   :  { %v2869_v30 = vmul.f32 0.5, %v2862_v24  ;;  %v2874_v47 = vmul.f32 0.5, %v2864_v39 }
 0x5f7   :  { %4721 = vtanh.f32 %v2865_v28 }
 0x5f8   :  { %4723 = vtanh.f32 %v2869_v30 }
 0x5f9   :  { %4725 = vtanh.f32 %v2863_v31 }
 0x5fa   :  { %4727 = vtanh.f32 %v2698_v34 }
 0x5fb   :  { %v4716_v35 = vpop.eup %4715  ;;  %4729 = vtanh.f32 %v2874_v47 }
 0x5fc   :  { %v4718_v58 = vpop.eup %4717  ;;  %v2691_v43 = vmul.f32 0.5, %v4716_v35 }
 0x5fd   :  { %v2695_v62 = vmul.f32 0.5, %v4718_v58  ;;  %v4720_v46 = vpop.eup %4719 }
 0x5fe   :  { %v2692_v44 = vadd.f32 0.5, %v2691_v43 }
 0x5ff   :  { %v2696_v9 = vadd.f32 0.5, %v2695_v62 }
 0x600   :  { %v2703_v61 = vmul.f32 %v4720_v46, %v2692_v44 }
 0x601   :  { %v4722_v48 = vpop.eup %4721  ;;  %v2702_v51 = vmul.f32 %v2696_v9, %v5114_v27 }
 0x602   :  { %v4724_v59 = vpop.eup %4723  ;;  %v2867_v63 = vmul.f32 0.5, %v4722_v48 }
 0x603   :  { %v5158_v1 = vadd.f32 %v2703_v61, %v2702_v51  ;;  %v2871_v3 = vmul.f32 0.5, %v4724_v59  ;;  %v4726_v8 = vpop.eup %4725 }
 0x604   :  { %v2868_v5 = vadd.f32 0.5, %v2867_v63  ;;  %v4728_v14 = vpop.eup %4727 }
 0x605   :  { %4731 = vtanh.f32 %v5158_v1  ;;  %v2872_v56 = vadd.f32 0.5, %v2871_v3  ;;  %v2700_v18 = vmul.f32 0.5, %v4728_v14  ;;  %v4730_v27 = vpop.eup %4729 }
 0x606   :  { %v2882_v12 = vmul.f32 %v4726_v8, %v2868_v5  ;;  %v2876_v20 = vmul.f32 0.5, %v4730_v27 }
 0x607   :  { %v2881_v55 = vmul.f32 %v2879_v10, %v2872_v56  ;;  %v2701_v42 = vadd.f32 0.5, %v2700_v18 }
 0x608   :  { %v2877_v40 = vadd.f32 0.5, %v2876_v20 }
 0x609   :  { %v5162_v16 = vadd.f32 %v2882_v12, %v2881_v55 }
 0x60b   :  { %4733 = vtanh.f32 %v5162_v16 }
 0x60f   :  { %v4732_v19 = vpop.eup %4731 }
 0x610   :  { %v2706_v36 = vmul.f32 %v4732_v19, %v2701_v42 }
 0x612   :  { %4292 = vmatmul.mubr.msk.f32.vlgmr.msra.gmra.mrb[22].mxu0 %vm406_vm2, %v2706_v36  ;;  %4293 = vmatmul.mubr.msk.f32.vlgmr.msra.gmra.mrb[26].mxu1 %vm406_vm2, %v2706_v36 }
 0x613   :  { %4512 = vmatpush1.bf16.msra.mxu0 %v4897_v49  ;;  %4516 = vmatpush1.bf16.msra.mxu1 %v4902_v53 }
 0x614   :  { %3099 = vmatprep.mubr.f32.mxu0 %v4812_v0  ;;  %3170 = vmatprep.mubr.f32.mxu1 %v4812_v0 }
 0x615   :  { %v4734_v22 = vpop.eup %4733  ;;  %4518 = vmatprep.subr.bf16.mxu0 %v4847_v7  ;;  %4522 = vmatprep.subr.bf16.mxu1 %v4854_v15 }
 0x616   :  { %v2885_v24 = vmul.f32 %v4734_v22, %v2877_v40 }
 0x618   :  { %v3032_v6 = vrot.slane %v2885_v24, 5 }
 0x61a   :  { %4294 = vmatmul.mubr.msk.f32.vlgmr.msra.gmra.mrb[22].mxu0 %vm238_vm1, %v3032_v6  ;;  %4295 = vmatmul.mubr.msk.f32.vlgmr.msra.gmra.mrb[26].mxu1 %vm238_vm1, %v3032_v6 }
 0x61b   :  { %4520 = vmatpush1.bf16.msra.mxu0 %v4850_v11  ;;  %4524 = vmatpush1.bf16.msra.mxu1 %v4858_v17 }
 0x61c   :  { %3263 = vmatprep.mubr.f32.mxu0 %v4812_v0  ;;  %3334 = vmatprep.mubr.f32.mxu1 %v4812_v0 }
 0x61d   :  { %4526 = vmatprep.subr.bf16.mxu0 %v4867_v21  ;;  %4534 = vmatprep.subr.bf16.mxu1 %v4869_v25 }
 0x61e   :  { %4296 = vmatmul.mubr.msk.f32.vlgmr.msra.gmra.mrb[24].mxu0 %vm238_vm1, %v3032_v6  ;;  %4297 = vmatmul.mubr.msk.f32.vlgmr.msra.gmra.mrb[28].mxu1 %vm238_vm1, %v3032_v6 }
 0x61f   :  { %4528 = vmatpush1.bf16.msra.mxu0 %v4871_v26  ;;  %4536 = vmatpush1.bf16.msra.mxu1 %v4874_v29 }
 0x620   :  { %4530 = vmatprep.subr.bf16.mxu0 %v4879_v33  ;;  %4538 = vmatprep.subr.bf16.mxu1 %v4881_v37 }
 0x621   :  { %3445 = vmatprep.mubr.f32.mxu0 %v4812_v0  ;;  %3516 = vmatprep.mubr.f32.mxu1 %v4812_v0 }
 0x623   :  { %4532 = vmatpush1.bf16.msra.mxu0 %v4883_v38  ;;  %4540 = vmatpush1.bf16.msra.mxu1 %v4886_v41 }
 0x624   :  { %4542 = vmatprep.subr.bf16.mxu0 %v4894_v45  ;;  %4546 = vmatprep.subr.bf16.mxu1 %v4899_v50 }
 0x6ed   :  { %v3101_v28 = vpop.f32.mrb[22].mxu0  ;;  %v3172_v30 = vpop.f32.mrb[26].mxu1 }
 0x6ee   :  { %v3177_v31 = vadd.f32 %v3101_v28, %v4960_v52  ;;  %v3103_v32 = vpop.f32.mrb[23].mxu0  ;;  %v3174_v34 = vpop.f32.mrb[27].mxu1  ;;  %v3179_v44 = vadd.f32 %v3172_v30, %v4968_v60 }
 0x6ef   :  { %v3178_v35 = vadd.f32 %v3103_v32, %v4964_v54  ;;  %v3180_v63 = vadd.f32 %v3174_v34, %v4974_v57 }
 0x6f0   :  { %v3181_v39 = vmul.f32 0.5, %v3177_v31 }
 0x6f1   :  { %v3185_v58 = vmul.f32 0.5, %v3178_v35  ;;  %v3265_v43 = vpop.f32.mrb[24].mxu0  ;;  %v3336_v62 = vpop.f32.mrb[28].mxu1  ;;  %v3190_v10 = vmul.f32 0.5, %v3180_v63 }
 0x6f2   :  { %4735 = vtanh.f32 %v3181_v39  ;;  %v3345_v46 = vrot.slane %v3265_v43, 2  ;;  %v3267_v9 = vpop.f32.mrb[25].mxu0  ;;  %v3338_v47 = vpop.f32.mrb[29].mxu1  ;;  %v3347_v51 = vrot.slane %v3336_v62, 2  ;;  %v3371_v39 = vrot.slane %v5162_v16, 7 }
 0x6f3   :  { %4737 = vtanh.f32 %v3185_v58  ;;  %v3346_v61 = vrot.slane %v3267_v9, 2  ;;  %v3348_v56 = vrot.slane %v3338_v47, 2 }
 0x6f4   :  { %v3353_v48 = vadd.f32 %v3345_v46, %v4918_v2  ;;  %4739 = vtanh.f32 %v3179_v44  ;;  %v3355_v8 = vadd.f32 %v3347_v51, %v4927_v13 }
 0x6f5   :  { %v3354_v59 = vadd.f32 %v3346_v61, %v4920_v4  ;;  %v3356_v14 = vadd.f32 %v3348_v56, %v4932_v23 }
 0x6f6   :  { %v3357_v3 = vmul.f32 0.5, %v3353_v48 }
 0x6f7   :  { %v3361_v5 = vmul.f32 0.5, %v3354_v59  ;;  %v3366_v20 = vmul.f32 0.5, %v3356_v14 }
 0x6f8   :  { %4741 = vtanh.f32 %v3357_v3 }
 0x6f9   :  { %4743 = vtanh.f32 %v3361_v5 }
 0x6fa   :  { %4745 = vtanh.f32 %v3355_v8 }
 0x6fb   :  { %4747 = vtanh.f32 %v3190_v10 }
 0x6fc   :  { %v4736_v12 = vpop.eup %4735  ;;  %4749 = vtanh.f32 %v3366_v20 }
 0x6fd   :  { %v4738_v55 = vpop.eup %4737  ;;  %v3183_v18 = vmul.f32 0.5, %v4736_v12 }
 0x6fe   :  { %v3187_v27 = vmul.f32 0.5, %v4738_v55  ;;  %v4740_v19 = vpop.eup %4739 }
 0x6ff   :  { %v3184_v42 = vadd.f32 0.5, %v3183_v18 }
 0x700   :  { %v3188_v36 = vadd.f32 0.5, %v3187_v27 }
 0x701   :  { %v3195_v40 = vmul.f32 %v4740_v19, %v3184_v42 }
 0x702   :  { %v4742_v22 = vpop.eup %4741  ;;  %v3194_v24 = vmul.f32 %v3188_v36, %v5158_v1 }
 0x703   :  { %v4744_v6 = vpop.eup %4743  ;;  %v3359_v28 = vmul.f32 0.5, %v4742_v22 }
 0x704   :  { %v5202_v30 = vadd.f32 %v3195_v40, %v3194_v24  ;;  %v3363_v31 = vmul.f32 0.5, %v4744_v6  ;;  %v4746_v34 = vpop.eup %4745 }
 0x705   :  { %v3360_v32 = vadd.f32 0.5, %v3359_v28  ;;  %v4748_v43 = vpop.eup %4747 }
 0x706   :  { %4751 = vtanh.f32 %v5202_v30  ;;  %v3364_v35 = vadd.f32 0.5, %v3363_v31  ;;  %v3192_v46 = vmul.f32 0.5, %v4748_v43  ;;  %v4750_v1 = vpop.eup %4749 }
 0x707   :  { %v3374_v58 = vmul.f32 %v4746_v34, %v3360_v32  ;;  %v3368_v48 = vmul.f32 0.5, %v4750_v1 }
 0x708   :  { %v3373_v62 = vmul.f32 %v3371_v39, %v3364_v35  ;;  %v3193_v9 = vadd.f32 0.5, %v3192_v46 }
 0x709   :  { %v3369_v16 = vadd.f32 0.5, %v3368_v48 }
 0x70a   :  { %v5206_v44 = vadd.f32 %v3374_v58, %v3373_v62 }
 0x70c   :  { %4753 = vtanh.f32 %v5206_v44  ;;  %v3863_v43 = vrot.slane %v5206_v44, 7 }
 0x710   :  { %v4752_v47 = vpop.eup %4751 }
 0x711   :  { %v3198_v61 = vmul.f32 %v4752_v47, %v3193_v9 }
 0x713   :  { %4298 = vmatmul.mubr.msk.f32.vlgmr.msra.gmra.mrb[26].mxu0 %vm406_vm2, %v3198_v61  ;;  %4299 = vmatmul.mubr.msk.f32.vlgmr.msra.gmra.mrb[30].mxu1 %vm406_vm2, %v3198_v61 }
 0x714   :  { %4544 = vmatpush1.bf16.msra.mxu0 %v4897_v49  ;;  %4548 = vmatpush1.bf16.msra.mxu1 %v4902_v53 }
 0x715   :  { %3591 = vmatprep.mubr.f32.mxu0 %v4812_v0  ;;  %3662 = vmatprep.mubr.f32.mxu1 %v4812_v0 }
 0x716   :  { %v4754_v51 = vpop.eup %4753  ;;  %4550 = vmatprep.subr.bf16.mxu0 %v4847_v7  ;;  %4554 = vmatprep.subr.bf16.mxu1 %v4854_v15 }
 0x717   :  { %v3377_v59 = vmul.f32 %v4754_v51, %v3369_v16 }
 0x719   :  { %v3524_v63 = vrot.slane %v3377_v59, 6 }
 0x71b   :  { %4300 = vmatmul.mubr.msk.f32.vlgmr.msra.gmra.mrb[26].mxu0 %vm238_vm1, %v3524_v63  ;;  %4301 = vmatmul.mubr.msk.f32.vlgmr.msra.gmra.mrb[30].mxu1 %vm238_vm1, %v3524_v63 }
 0x71c   :  { %4552 = vmatpush1.bf16.msra.mxu0 %v4850_v11  ;;  %4556 = vmatpush1.bf16.msra.mxu1 %v4858_v17 }
 0x71d   :  { %3755 = vmatprep.mubr.f32.mxu0 %v4812_v0  ;;  %3826 = vmatprep.mubr.f32.mxu1 %v4812_v0 }
 0x71e   :  { %4558 = vmatprep.subr.bf16.mxu0 %v4867_v21  ;;  %4566 = vmatprep.subr.bf16.mxu1 %v4869_v25 }
 0x71f   :  { %4302 = vmatmul.mubr.msk.f32.vlgmr.msra.gmra.mrb[28].mxu0 %vm238_vm1, %v3524_v63  ;;  %4303 = vmatmul.mubr.msk.f32.vlgmr.msra.gmra.mrb[32].mxu1 %vm238_vm1, %v3524_v63 }
 0x720   :  { %4560 = vmatpush1.bf16.msra.mxu0 %v4871_v26  ;;  %4568 = vmatpush1.bf16.msra.mxu1 %v4874_v29 }
 0x721   :  { %4562 = vmatprep.subr.bf16.mxu0 %v4879_v33  ;;  %4570 = vmatprep.subr.bf16.mxu1 %v4881_v37 }
 0x722   :  { %3937 = vmatprep.mubr.f32.mxu0 %v4812_v0  ;;  %4008 = vmatprep.mubr.f32.mxu1 %v4812_v0 }
 0x724   :  { %4564 = vmatpush1.bf16.msra.mxu0 %v4883_v38  ;;  %4572 = vmatpush1.bf16.msra.mxu1 %v4886_v41 }
 0x725   :  { %4574 = vmatprep.subr.bf16.mxu0 %v4894_v45  ;;  %4578 = vmatprep.subr.bf16.mxu1 %v4899_v50 }
 0x7ee   :  { %v3593_v7 = vpop.f32.mrb[26].mxu0  ;;  %v3664_v11 = vpop.f32.mrb[30].mxu1 }
 0x7ef   :  { %v3669_v15 = vadd.f32 %v3593_v7, %v4960_v52  ;;  %v3595_v17 = vpop.f32.mrb[27].mxu0  ;;  %v3666_v21 = vpop.f32.mrb[31].mxu1  ;;  %v3671_v38 = vadd.f32 %v3664_v11, %v4968_v60  ;;  %v65_v11 = vld [vmem:[#allocation2 + $0x160] sm:$0xff] }
 0x7f0   :  { %v3670_v25 = vadd.f32 %v3595_v17, %v4964_v54  ;;  %v3672_v10 = vadd.f32 %v3666_v21, %v4974_v57  ;;  %v4813_v21 = vmov 0.0|0.0  }
 0x7f1   :  { %v3673_v26 = vmul.f32 0.5, %v3669_v15  ;;  %v66_v15 = vld [vmem:[#allocation2 + $0x180] sm:$0xff] }
 0x7f2   :  { %v3677_v29 = vmul.f32 0.5, %v3670_v25  ;;  %v3757_v33 = vpop.f32.mrb[28].mxu0  ;;  %v3828_v37 = vpop.f32.mrb[32].mxu1  ;;  %v3682_v27 = vmul.f32 0.5, %v3672_v10  ;;  %v4582_v17 = vpack.c.bf16 %v66_v15, %v65_v11 }
 0x7f3   :  { %4755 = vtanh.f32 %v3673_v26  ;;  %v3837_v41 = vrot.slane %v3757_v33, 1  ;;  %v3759_v3 = vpop.f32.mrb[29].mxu0  ;;  %v3830_v45 = vpop.f32.mrb[33].mxu1  ;;  %v3839_v8 = vrot.slane %v3828_v37, 1 }
 0x7f4   :  { %4757 = vtanh.f32 %v3677_v29  ;;  %v3838_v50 = vrot.slane %v3759_v3, 1  ;;  %v3840_v18 = vrot.slane %v3830_v45, 1 }
 0x7f5   :  { %v3845_v5 = vadd.f32 %v3837_v41, %v4918_v2  ;;  %4759 = vtanh.f32 %v3671_v38  ;;  %v3847_v55 = vadd.f32 %v3839_v8, %v4927_v13 }
 0x7f6   :  { %v3846_v56 = vadd.f32 %v3838_v50, %v4920_v4  ;;  %v3848_v19 = vadd.f32 %v3840_v18, %v4932_v23 }
 0x7f7   :  { %v3849_v12 = vmul.f32 0.5, %v3845_v5 }
 0x7f8   :  { %v3853_v14 = vmul.f32 0.5, %v3846_v56  ;;  %v3858_v24 = vmul.f32 0.5, %v3848_v19 }
 0x7f9   :  { %4761 = vtanh.f32 %v3849_v12 }
 0x7fa   :  { %4763 = vtanh.f32 %v3853_v14 }
 0x7fb   :  { %4765 = vtanh.f32 %v3847_v55 }
 0x7fc   :  { %4767 = vtanh.f32 %v3682_v27 }
 0x7fd   :  { %v4756_v42 = vpop.eup %4755  ;;  %4769 = vtanh.f32 %v3858_v24 }
 0x7fe   :  { %v4758_v36 = vpop.eup %4757  ;;  %v3675_v2 = vmul.f32 0.5, %v4756_v42 }
 0x7ff   :  { %v3679_v20 = vmul.f32 0.5, %v4758_v36  ;;  %v4760_v40 = vpop.eup %4759 }
 0x800   :  { %v3676_v4 = vadd.f32 0.5, %v3675_v2 }
 0x801   :  { %v3680_v22 = vadd.f32 0.5, %v3679_v20 }
 0x802   :  { %v3687_v6 = vmul.f32 %v4760_v40, %v3676_v4 }
 0x803   :  { %v4762_v28 = vpop.eup %4761  ;;  %v3686_v31 = vmul.f32 %v3680_v22, %v5202_v30 }
 0x804   :  { %v4764_v13 = vpop.eup %4763  ;;  %v3851_v32 = vmul.f32 0.5, %v4762_v28 }
 0x805   :  { %v5246_v34 = vadd.f32 %v3687_v6, %v3686_v31  ;;  %v3855_v35 = vmul.f32 0.5, %v4764_v13  ;;  %v4766_v23 = vpop.eup %4765 }
 0x806   :  { %v3852_v39 = vadd.f32 0.5, %v3851_v32  ;;  %v4768_v46 = vpop.eup %4767 }
 0x807   :  { %4771 = vtanh.f32 %v5246_v34  ;;  %v3856_v58 = vadd.f32 0.5, %v3855_v35  ;;  %v3684_v47 = vmul.f32 0.5, %v4768_v46  ;;  %v4770_v30 = vpop.eup %4769 }
 0x808   :  { %v3866_v62 = vmul.f32 %v4766_v23, %v3852_v39  ;;  %v3860_v51 = vmul.f32 0.5, %v4770_v30 }
 0x809   :  { %v3865_v1 = vmul.f32 %v3863_v43, %v3856_v58  ;;  %v3685_v61 = vadd.f32 0.5, %v3684_v47 }
 0x80a   :  { %v3861_v44 = vadd.f32 0.5, %v3860_v51 }
 0x80b   :  { %v3867_v9 = vadd.f32 %v3866_v62, %v3865_v1 }
 0x80d   :  { %4773 = vtanh.f32 %v3867_v9 }
 0x811   :  { %v4772_v48 = vpop.eup %4771 }
 0x812   :  { %v3690_v16 = vmul.f32 %v4772_v48, %v3685_v61 }
 0x814   :  { %4304 = vmatmul.mubr.msk.f32.vlgmr.msra.gmra.mrb[30].mxu0 %vm406_vm2, %v3690_v16  ;;  %4305 = vmatmul.mubr.msk.f32.vlgmr.msra.gmra.mrb[34].mxu1 %vm406_vm2, %v3690_v16 }
 0x815   :  { %4576 = vmatpush1.bf16.msra.mxu0 %v4897_v49  ;;  %4580 = vmatpush1.bf16.msra.mxu1 %v4902_v53  ;;  %v67_v49 = vld [vmem:[#allocation2 + $0x1a0] sm:$0xff] }
 0x816   :  { %4083 = vmatprep.mubr.f32.mxu0 %v4812_v0  ;;  %4154 = vmatprep.mubr.f32.mxu1 %v4812_v0  ;;  %v68_v53 = vld [vmem:[#allocation2 + $0x1c0] sm:$0xff] }
 0x817   :  { %v4774_v59 = vpop.eup %4773  ;;  %4581 = vmatprep.subr.bf16.mxu0 %v4813_v21  ;;  %v4585_v25 = vpack.c.bf16 %v68_v53, %v67_v49 }
 0x818   :  { %v3869_v63 = vmul.f32 %v4774_v59, %v3861_v44 }
 0x81a   :  { %v4016_v7 = vrot.slane %v3869_v63, 7 }
 0x81c   :  { %4306 = vmatmul.mubr.msk.f32.vlgmr.msra.gmra.mrb[30].mxu0 %vm238_vm1, %v4016_v7  ;;  %4307 = vmatmul.mubr.msk.f32.vlgmr.msra.gmra.mrb[34].mxu1 %vm238_vm1, %v4016_v7 }
 0x81d   :  { %4583 = vmatpush3.bf16.msra.mxu0 %v4582_v17  ;;  %4322 = vmatprep.mubr.msk.f32.mxu0 %vm4814_vm3, %v4812_v0 }
 0x81e   :  { %4584 = vmatprep.subr.bf16.mxu0 %v4813_v21 }
 0x821   :  { %4586 = vmatpush3.bf16.msra.mxu0 %v4585_v25 }
 0x8ef   :  { %v4085_v26 = vpop.f32.mrb[30].mxu0  ;;  %v4156_v29 = vpop.f32.mrb[34].mxu1 }
 0x8f0   :  { %v4161_v33 = vadd.f32 %v4085_v26, %v4960_v52  ;;  %v4087_v37 = vpop.f32.mrb[31].mxu0  ;;  %v4158_v38 = vpop.f32.mrb[35].mxu1  ;;  %v4163_v50 = vadd.f32 %v4156_v29, %v4968_v60 }
 0x8f1   :  { %v4162_v41 = vadd.f32 %v4087_v37, %v4964_v54  ;;  %v4164_v5 = vadd.f32 %v4158_v38, %v4974_v57  ;;  %v69_v57 = vld [vmem:[#allocation2 + $0x1e0] ss:$0 sm:$0xff] }
 0x8f2   :  { %v4165_v3 = vmul.f32 0.5, %v4161_v33 }
 0x8f3   :  { %v4169_v45 = vmul.f32 0.5, %v4162_v41  ;;  %v4174_v8 = vmul.f32 0.5, %v4164_v5 }
 0x8f4   :  { %4775 = vtanh.f32 %v4165_v3 }
 0x8f5   :  { %4777 = vtanh.f32 %v4169_v45 }
 0x8f6   :  { %4779 = vtanh.f32 %v4163_v50 }
 0x8f7   :  { %4781 = vtanh.f32 %v4174_v8 }
 0x8fe   :  { %v4776_v56 = vpop.eup %4775 }
 0x8ff   :  { %v4778_v0 = vpop.eup %4777  ;;  %v4167_v10 = vmul.f32 0.5, %v4776_v56 }
 0x900   :  { %v4171_v12 = vmul.f32 0.5, %v4778_v0  ;;  %v4780_v14 = vpop.eup %4779 }
 0x901   :  { %v4168_v52 = vadd.f32 0.5, %v4167_v10  ;;  %v4782_v42 = vpop.eup %4781 }
 0x902   :  { %v4172_v55 = vadd.f32 0.5, %v4171_v12  ;;  %v4176_v60 = vmul.f32 0.5, %v4782_v42 }
 0x903   :  { %v4179_v18 = vmul.f32 %v4780_v14, %v4168_v52 }
 0x904   :  { %v4178_v54 = vmul.f32 %v4172_v55, %v5246_v34  ;;  %v4177_v19 = vadd.f32 0.5, %v4176_v60 }
 0x906   :  { %v4180_v27 = vadd.f32 %v4179_v18, %v4178_v54 }
 0x908   :  { %4783 = vtanh.f32 %v4180_v27 }
 0x912   :  { %v4784_v36 = vpop.eup %4783 }
 0x913   :  { %v4182_v2 = vmul.f32 %v4784_v36, %v4177_v19 }
 0x915   :  { %4323 = vmatmul.mubr.msk.f32.vlgmr.msra.gmra.mrb[32].mxu0 %vm406_vm2, %v4182_v2 }
 0x9e8   :  { %v4252_v20 = vpop.f32.mrb[32].mxu0 }
 0x9e9   :  { %v4253_v4 = vadd.f32 %v4252_v20, %v69_v57  ;;  %v4324_v40 = vpop.f32.mrb[33].mxu0 }
 0x9eb   :  { %4256 = vst [vmem:[%s5270_s2] sm:$0x1] %v4253_v4 }
 0x9ec   :  { %4261 = vsyncpa [#allocation3], 1 }

</bundles_post_ra>
